<compile_context>
chip_gen: v7x
topology: tpu7x:2x2x1
jax: 0.10.0
libtpu: 0.0.40
codegen_flags: <defaults>
</compile_context>

<pallas_src>
import math

import jax
import jax.numpy as jnp
from jax import lax
from jax.experimental import pallas as pl
from jax.experimental.pallas import tpu as pltpu


# ------------------------------ fused kernel --------------------------------

def _sigmoid(z):
    return 1.0 / (1.0 + jnp.exp(-z))


def _conv_bn_relu_pool(y, sm1, sp1, w_ref, b, gamma, beta, n_rows):
    """Conv1d(k=3,s=1,p=1) + BatchNorm1d(train) + ReLU + MaxPool1d(2).

    y    : (n_rows, Cin) flattened (batch-major) input, n_rows = B*L
    sm1  : (n_rows, n_rows) block-diagonal "pick row r-1 (zero at l==0)" matrix
    sp1  : (n_rows, n_rows) block-diagonal "pick row r+1 (zero at l==L-1)" matrix
    w_ref: (3, Cin, Cout) conv weight ref;  b/gamma/beta: (1, Cout)
    returns (n_rows // 2, Cout)
    """
    Cout = w_ref.shape[-1]

    # 3-tap conv: every tap is an aligned MXU matmul; zero padding is encoded in
    # the (exact, 0/1) shift matrices, so no unaligned sublane slices are needed.
    acc = jnp.dot(y, w_ref[1], preferred_element_type=jnp.float32) + b
    acc = acc + jnp.dot(sm1, jnp.dot(y, w_ref[0], preferred_element_type=jnp.float32),
                        preferred_element_type=jnp.float32)
    acc = acc + jnp.dot(sp1, jnp.dot(y, w_ref[2], preferred_element_type=jnp.float32),
                        preferred_element_type=jnp.float32)

    # BatchNorm1d, training mode: biased statistics over batch*length.
    inv_n = 1.0 / n_rows
    mean = jnp.sum(acc, axis=0, keepdims=True) * inv_n
    d = acc - mean
    var = jnp.sum(d * d, axis=0, keepdims=True) * inv_n
    z = d * lax.rsqrt(var + 1e-5) * gamma + beta

    # ReLU + MaxPool1d(2) along length (pairs of consecutive rows share a batch).
    z = jnp.maximum(z, 0.0)
    return jnp.max(z.reshape(n_rows // 2, 2, Cout), axis=1)


def crnn_fused_kernel(x_ref, s1m_ref, s1p_ref, s2m_ref, s2p_ref,
                      w1_ref, b1_ref, g1_ref, be1_ref,
                      w2_ref, b2_ref, g2_ref, be2_ref,
                      wih_ref, whh_ref, bg_ref, wfc_ref, bfc_ref, mT_ref,
                      o_ref, hseq_ref):
    # x_ref : (B, h, Cin)                 o_ref : (B, h, K)
    # wih   : (D, 4*Hp)  whh: (Hp, 4*Hp)  bg: (1, 4*Hp)   (gate order i,f,g,o)
    # wfc   : (Hp, K)    bfc: (1, K)      mT: (h, T)
    # hseq_ref (scratch): (T, B, Hp)
    B, h_len, Cin = x_ref.shape
    Hp = whh_ref.shape[0]
    T = hseq_ref.shape[0]

    # ---------------- CNN feature extractor (all resident in VMEM) ----------
    x_flat = x_ref[...].reshape(B * h_len, Cin)
    y = _conv_bn_relu_pool(x_flat, s1m_ref[...], s1p_ref[...], w1_ref,
                           b1_ref[...], g1_ref[...], be1_ref[...], B * h_len)
    y = _conv_bn_relu_pool(y, s2m_ref[...], s2p_ref[...], w2_ref,
                           b2_ref[...], g2_ref[...], be2_ref[...], B * (h_len // 2))
    # y: (B*T, D=64), rows batch-major.

    # ---------------- LSTM: hoisted input projection + merged gates ---------
    xw = jnp.dot(y, wih_ref[...], preferred_element_type=jnp.float32) + bg_ref[...]
    xw = xw.reshape(B, T, 4 * Hp)

    whh = whh_ref[...]
    h = jnp.zeros((B, Hp), jnp.float32)
    c = jnp.zeros((B, Hp), jnp.float32)
    for t in range(T):                      # T is tiny & static -> fully unrolled
        gates = xw[:, t, :] + jnp.dot(h, whh, preferred_element_type=jnp.float32)
        i = _sigmoid(gates[:, 0 * Hp:1 * Hp])
        f = _sigmoid(gates[:, 1 * Hp:2 * Hp])
        g = jnp.tanh(gates[:, 2 * Hp:3 * Hp])
        o = _sigmoid(gates[:, 3 * Hp:4 * Hp])
        c = f * c + i * g
        h = o * jnp.tanh(c)
        hseq_ref[t] = h

    # ---------------- epilogue: interpolation (matmul with M^T) + FC head ----
    # interp and FC are both linear and each interp row sums to 1, so
    # M^T @ (H @ Wfc + bfc) == (M^T @ H) @ Wfc + bfc.
    hs_all = hseq_ref[...]                   # (T, B, Hp)
    mT = mT_ref[...]                         # (h, T)
    wfc = wfc_ref[...]                       # (Hp, K)
    bfc = bfc_ref[...]                       # (1, K)
    for b in range(B):
        hb = hs_all[:, b, :]                                                   # (T, Hp)
        hin = jnp.dot(mT, hb, preferred_element_type=jnp.float32)              # (h, Hp)
        o_ref[b] = jnp.dot(hin, wfc, preferred_element_type=jnp.float32) + bfc  # (h, K)


# ----------------------------- pallas_call wrapper ---------------------------

def _full_spec(shape):
    return pl.BlockSpec(shape, lambda i: (0,) * len(shape))


def _shift_mats(B, L):
    # Block-diagonal (per-batch) shift matrices for flattened (B*L, C) rows.
    n = B * L
    r = jnp.arange(n)
    rr, cc = r[:, None], r[None, :]
    sm1 = ((cc == rr - 1) & ((rr % L) != 0)).astype(jnp.float32)        # row r <- r-1
    sp1 = ((cc == rr + 1) & ((rr % L) != (L - 1))).astype(jnp.float32)  # row r <- r+1
    return sm1, sp1


def crnn_forward(x, kp):
    B, h_len, _ = x.shape
    c1, c2 = kp["cnn"]
    K = kp["wfc"].shape[-1]
    Hp = kp["whh"].shape[0]
    T = h_len // 4
    s1m, s1p = _shift_mats(B, h_len)
    s2m, s2p = _shift_mats(B, h_len // 2)

    args = (x.astype(jnp.float32), s1m, s1p, s2m, s2p,
            c1["w"], c1["b"], c1["gamma"], c1["beta"],
            c2["w"], c2["b"], c2["gamma"], c2["beta"],
            kp["wih"], kp["whh"], kp["bg"], kp["wfc"], kp["bfc"], kp["mT"])

    return pl.pallas_call(
        crnn_fused_kernel,
        out_shape=jax.ShapeDtypeStruct((B, h_len, K), jnp.float32),
        grid=(1,),
        in_specs=[_full_spec(a.shape) for a in args],
        out_specs=_full_spec((B, h_len, K)),
        scratch_shapes=[pltpu.VMEM((T, B, Hp), jnp.float32)],
        compiler_params=pltpu.CompilerParams(dimension_semantics=("arbitrary",)),
    )(*args)


# ----------------------------- parameters ------------------------------------

def build_interp_matrix(l_in, l_out):
    # F.interpolate(mode='linear', align_corners=False) as an (l_in, l_out) matrix.
    scale = l_in / l_out
    m = [[0.0] * l_out for _ in range(l_in)]
    for j in range(l_out):
        src = (j + 0.5) * scale - 0.5
        if src < 0.0:
            src = 0.0
        i0 = min(int(math.floor(src)), l_in - 1)
        i1 = i0 + 1 if i0 < l_in - 1 else i0
        lam = src - math.floor(src) if i0 < l_in - 1 else 0.0
        m[i0][j] += 1.0 - lam
        m[i1][j] += lam
    return jnp.asarray(m, dtype=jnp.float32)


def init_params(key, in_channels=6, num_classes=5, cnn_dims=(64, 64), embed=50,
                h_len=16, h_pad=64):
    keys = jax.random.split(key, 6)
    ki = 0
    torch_p = {"cnn": []}
    kern_p = {"cnn": []}

    cin = in_channels
    for cout in cnn_dims:
        fan_in = cin * 3
        w = jax.random.normal(keys[ki], (cout, cin, 3), jnp.float32) * math.sqrt(2.0 / fan_in)
        ki += 1
        torch_p["cnn"].append({"w": w,
                               "b": jnp.zeros((cout,), jnp.float32),
                               "gamma": jnp.ones((cout,), jnp.float32),
                               "beta": jnp.zeros((cout,), jnp.float32)})
        kern_p["cnn"].append({"w": jnp.transpose(w, (2, 1, 0)),          # (3, Cin, Cout)
                              "b": jnp.zeros((1, cout), jnp.float32),
                              "gamma": jnp.ones((1, cout), jnp.float32),
                              "beta": jnp.zeros((1, cout), jnp.float32)})
        cin = cout

    D, H = cnn_dims[-1], embed
    ortho = jax.nn.initializers.orthogonal()
    w_ih = ortho(keys[ki], (4 * H, D), jnp.float32); ki += 1            # torch (4H, D)
    w_hh = ortho(keys[ki], (4 * H, H), jnp.float32); ki += 1            # torch (4H, H)
    fc_w = jax.random.normal(keys[ki], (num_classes, H), jnp.float32) * math.sqrt(2.0 / H)
    ki += 1
    T = h_len // 4
    interp_m = build_interp_matrix(T, h_len)                            # (T, h)

    torch_p.update(w_ih=w_ih, w_hh=w_hh,
                   b_ih=jnp.zeros((4 * H,), jnp.float32),
                   b_hh=jnp.zeros((4 * H,), jnp.float32),
                   fc_w=fc_w, fc_b=jnp.zeros((num_classes,), jnp.float32),
                   interp_m=interp_m)

    def merged_gates(wt, in_dim, in_pad):
        # torch (4H, in_dim) -> zero-padded merged (in_pad, 4*h_pad), gates i,f,g,o.
        w4 = jnp.transpose(wt.reshape(4, H, in_dim), (0, 2, 1))         # (gate, in, out)
        w4 = jnp.pad(w4, ((0, 0), (0, in_pad - in_dim), (0, h_pad - H)))
        return jnp.transpose(w4, (1, 0, 2)).reshape(in_pad, 4 * h_pad)

    kern_p["wih"] = merged_gates(w_ih, D, D)                            # (D, 4*Hp)
    kern_p["whh"] = merged_gates(w_hh, H, h_pad)                        # (Hp, 4*Hp)
    kern_p["bg"] = jnp.zeros((1, 4 * h_pad), jnp.float32)               # b_ih + b_hh (== 0 here)
    kern_p["wfc"] = jnp.pad(fc_w.T, ((0, h_pad - H), (0, 0)))           # (Hp, K)
    kern_p["bfc"] = jnp.zeros((1, num_classes), jnp.float32)
    kern_p["mT"] = interp_m.T                                           # (h, T)
    return torch_p, kern_p


# ----------------------------- pure-JAX reference ----------------------------

def reference_forward(x, tp):
    y = x.astype(jnp.float32)
    for blk in tp["cnn"]:
        w = blk["w"]                                   # (Cout, Cin, 3)
        Bc, L, _ = y.shape
        Cout = w.shape[0]
        xp = jnp.pad(y, ((0, 0), (1, 1), (0, 0)))
        acc = jnp.zeros((Bc, L, Cout), jnp.float32)
        for k in range(3):
            acc = acc + jnp.einsum("blc,oc->blo", xp[:, k:k + L, :], w[:, :, k])
        acc = acc + blk["b"][None, None, :]
        mean = jnp.mean(acc, axis=(0, 1), keepdims=True)
        var = jnp.mean((acc - mean) ** 2, axis=(0, 1), keepdims=True)
        z = (acc - mean) / jnp.sqrt(var + 1e-5) * blk["gamma"] + blk["beta"]
        z = jnp.maximum(z, 0.0)
        y = jnp.max(z.reshape(Bc, L // 2, 2, Cout), axis=2)

    B = y.shape[0]
    H = tp["w_hh"].shape[1]
    Wih, Whh = tp["w_ih"], tp["w_hh"]
    bias = tp["b_ih"] + tp["b_hh"]

    def step(carry, xt):
        h, c = carry
        gates = xt @ Wih.T + h @ Whh.T + bias
        i, f, g, o = jnp.split(gates, 4, axis=-1)
        i, f, o = jax.nn.sigmoid(i), jax.nn.sigmoid(f), jax.nn.sigmoid(o)
        g = jnp.tanh(g)
        c = f * c + i * g
        h = o * jnp.tanh(c)
        return (h, c), h

    _, hs = lax.scan(step,
                     (jnp.zeros((B, H), jnp.float32), jnp.zeros((B, H), jnp.float32)),
                     jnp.transpose(y, (1, 0, 2)))
    hs = jnp.transpose(hs, (1, 0, 2))                  # (B, T, H)
    logits = hs @ tp["fc_w"].T + tp["fc_b"]            # (B, T, K)
    logits = jnp.transpose(logits, (0, 2, 1))          # (B, K, T)
    out = jnp.einsum("bkt,tj->bkj", logits, tp["interp_m"])
    return jnp.transpose(out, (0, 2, 1))               # (B, h, K)


# ----------------------------- main ------------------------------------------

if __name__ == "__main__":
    key = jax.random.PRNGKey(0)
    kp_key, kx = jax.random.split(key)

    B, h_len, C = 2, 16, 6
    num_classes = 5
    torch_p, kern_p = init_params(kp_key, in_channels=C, num_classes=num_classes,
                                  cnn_dims=(64, 64), embed=50, h_len=h_len)
    x = jax.random.normal(kx, (B, h_len, C), jnp.float32)

    out = jax.block_until_ready(crnn_forward(x, kern_p))
    assert out.shape == (B, h_len, num_classes), out.shape

    ref = reference_forward(x, torch_p)
    err = float(jnp.max(jnp.abs(out - ref)))
    if not bool(jnp.allclose(out, ref, atol=2e-3, rtol=2e-2)):
        raise AssertionError(f"Pallas output mismatch vs JAX reference, max abs err={err}")

    print("KERNEL_OK")
</pallas_src>

<mosaic_0001>
module attributes {stable_mosaic.version = 11 : i64} {
  func.func @crnn_fused_kernel(%arg0: i32, %arg1: memref<2x16x6xf32, #tpu.memory_space<vmem>>, %arg2: memref<32x32xf32, #tpu.memory_space<vmem>>, %arg3: memref<32x32xf32, #tpu.memory_space<vmem>>, %arg4: memref<16x16xf32, #tpu.memory_space<vmem>>, %arg5: memref<16x16xf32, #tpu.memory_space<vmem>>, %arg6: memref<3x6x64xf32, #tpu.memory_space<vmem>>, %arg7: memref<1x64xf32, #tpu.memory_space<vmem>>, %arg8: memref<1x64xf32, #tpu.memory_space<vmem>>, %arg9: memref<1x64xf32, #tpu.memory_space<vmem>>, %arg10: memref<3x64x64xf32, #tpu.memory_space<vmem>>, %arg11: memref<1x64xf32, #tpu.memory_space<vmem>>, %arg12: memref<1x64xf32, #tpu.memory_space<vmem>>, %arg13: memref<1x64xf32, #tpu.memory_space<vmem>>, %arg14: memref<64x256xf32, #tpu.memory_space<vmem>>, %arg15: memref<64x256xf32, #tpu.memory_space<vmem>>, %arg16: memref<1x256xf32, #tpu.memory_space<vmem>>, %arg17: memref<64x5xf32, #tpu.memory_space<vmem>>, %arg18: memref<1x5xf32, #tpu.memory_space<vmem>>, %arg19: memref<16x4xf32, #tpu.memory_space<vmem>>, %arg20: memref<2x16x5xf32, #tpu.memory_space<vmem>>, %arg21: memref<4x2x64xf32, #tpu.memory_space<vmem>>) attributes {dimension_semantics = [#tpu.dimension_semantics<arbitrary>], iteration_bounds = array<i64: 1>, scalar_prefetch = 0 : i64, scratch_operands = 1 : i64, tpu.core_type = #tpu.core_type<tc>, window_params = [{pipeline_mode = #tpu.pipeline_mode<synchronous>, transform_indices = @transform_0, window_bounds = array<i64: 2, 16, 6>}, {pipeline_mode = #tpu.pipeline_mode<synchronous>, transform_indices = @transform_1, window_bounds = array<i64: 32, 32>}, {pipeline_mode = #tpu.pipeline_mode<synchronous>, transform_indices = @transform_2, window_bounds = array<i64: 32, 32>}, {pipeline_mode = #tpu.pipeline_mode<synchronous>, transform_indices = @transform_3, window_bounds = array<i64: 16, 16>}, {pipeline_mode = #tpu.pipeline_mode<synchronous>, transform_indices = @transform_4, window_bounds = array<i64: 16, 16>}, {pipeline_mode = #tpu.pipeline_mode<synchronous>, transform_indices = @transform_5, window_bounds = array<i64: 3, 6, 64>}, {pipeline_mode = #tpu.pipeline_mode<synchronous>, transform_indices = @transform_6, window_bounds = array<i64: 1, 64>}, {pipeline_mode = #tpu.pipeline_mode<synchronous>, transform_indices = @transform_7, window_bounds = array<i64: 1, 64>}, {pipeline_mode = #tpu.pipeline_mode<synchronous>, transform_indices = @transform_8, window_bounds = array<i64: 1, 64>}, {pipeline_mode = #tpu.pipeline_mode<synchronous>, transform_indices = @transform_9, window_bounds = array<i64: 3, 64, 64>}, {pipeline_mode = #tpu.pipeline_mode<synchronous>, transform_indices = @transform_10, window_bounds = array<i64: 1, 64>}, {pipeline_mode = #tpu.pipeline_mode<synchronous>, transform_indices = @transform_11, window_bounds = array<i64: 1, 64>}, {pipeline_mode = #tpu.pipeline_mode<synchronous>, transform_indices = @transform_12, window_bounds = array<i64: 1, 64>}, {pipeline_mode = #tpu.pipeline_mode<synchronous>, transform_indices = @transform_13, window_bounds = array<i64: 64, 256>}, {pipeline_mode = #tpu.pipeline_mode<synchronous>, transform_indices = @transform_14, window_bounds = array<i64: 64, 256>}, {pipeline_mode = #tpu.pipeline_mode<synchronous>, transform_indices = @transform_15, window_bounds = array<i64: 1, 256>}, {pipeline_mode = #tpu.pipeline_mode<synchronous>, transform_indices = @transform_16, window_bounds = array<i64: 64, 5>}, {pipeline_mode = #tpu.pipeline_mode<synchronous>, transform_indices = @transform_17, window_bounds = array<i64: 1, 5>}, {pipeline_mode = #tpu.pipeline_mode<synchronous>, transform_indices = @transform_18, window_bounds = array<i64: 16, 4>}, {pipeline_mode = #tpu.pipeline_mode<synchronous>, transform_indices = @transform_19, window_bounds = array<i64: 2, 16, 5>}]} {
    %c0 = arith.constant 0 : index
    %c0_0 = arith.constant 0 : index
    %c0_1 = arith.constant 0 : index
    %0 = vector.load %arg1[%c0, %c0_0, %c0_1] : memref<2x16x6xf32, #tpu.memory_space<vmem>>, vector<2x16x6xf32>
    %1 = vector.shape_cast %0 : vector<2x16x6xf32> to vector<32x6xf32>
    %c0_2 = arith.constant 0 : index
    %c0_3 = arith.constant 0 : index
    %2 = vector.load %arg2[%c0_2, %c0_3] : memref<32x32xf32, #tpu.memory_space<vmem>>, vector<32x32xf32>
    %c0_4 = arith.constant 0 : index
    %c0_5 = arith.constant 0 : index
    %3 = vector.load %arg3[%c0_4, %c0_5] : memref<32x32xf32, #tpu.memory_space<vmem>>, vector<32x32xf32>
    %c0_6 = arith.constant 0 : index
    %c0_7 = arith.constant 0 : index
    %4 = vector.load %arg7[%c0_6, %c0_7] : memref<1x64xf32, #tpu.memory_space<vmem>>, vector<1x64xf32>
    %c0_8 = arith.constant 0 : index
    %c0_9 = arith.constant 0 : index
    %5 = vector.load %arg8[%c0_8, %c0_9] : memref<1x64xf32, #tpu.memory_space<vmem>>, vector<1x64xf32>
    %c0_10 = arith.constant 0 : index
    %c0_11 = arith.constant 0 : index
    %6 = vector.load %arg9[%c0_10, %c0_11] : memref<1x64xf32, #tpu.memory_space<vmem>>, vector<1x64xf32>
    %c1 = arith.constant 1 : index
    %c0_12 = arith.constant 0 : index
    %c0_13 = arith.constant 0 : index
    %7 = vector.load %arg6[%c1, %c0_12, %c0_13] : memref<3x6x64xf32, #tpu.memory_space<vmem>>, vector<1x6x64xf32>
    %8 = vector.shape_cast %7 : vector<1x6x64xf32> to vector<6x64xf32>
    %cst = arith.constant dense<0.000000e+00> : vector<32x64xf32>
    %9 = tpu.matmul %1, %8, %cst {dimension_numbers = #tpu.dot_dimension_numbers<[1], [0], [0], [1], [0, 0, 1, 1], [], []>} : vector<32x6xf32>, vector<6x64xf32>, vector<32x64xf32> -> vector<32x64xf32>
    %10 = vector.broadcast %4 : vector<1x64xf32> to vector<32x64xf32>
    %11 = arith.addf %9, %10 : vector<32x64xf32>
    %c0_14 = arith.constant 0 : index
    %c0_15 = arith.constant 0 : index
    %c0_16 = arith.constant 0 : index
    %12 = vector.load %arg6[%c0_14, %c0_15, %c0_16] : memref<3x6x64xf32, #tpu.memory_space<vmem>>, vector<1x6x64xf32>
    %13 = vector.shape_cast %12 : vector<1x6x64xf32> to vector<6x64xf32>
    %cst_17 = arith.constant dense<0.000000e+00> : vector<32x64xf32>
    %14 = tpu.matmul %1, %13, %cst_17 {dimension_numbers = #tpu.dot_dimension_numbers<[1], [0], [0], [1], [0, 0, 1, 1], [], []>} : vector<32x6xf32>, vector<6x64xf32>, vector<32x64xf32> -> vector<32x64xf32>
    %cst_18 = arith.constant dense<0.000000e+00> : vector<32x64xf32>
    %15 = tpu.matmul %2, %14, %cst_18 {dimension_numbers = #tpu.dot_dimension_numbers<[1], [0], [0], [1], [0, 0, 1, 1], [], []>} : vector<32x32xf32>, vector<32x64xf32>, vector<32x64xf32> -> vector<32x64xf32>
    %16 = arith.addf %11, %15 : vector<32x64xf32>
    %c2 = arith.constant 2 : index
    %c0_19 = arith.constant 0 : index
    %c0_20 = arith.constant 0 : index
    %17 = vector.load %arg6[%c2, %c0_19, %c0_20] : memref<3x6x64xf32, #tpu.memory_space<vmem>>, vector<1x6x64xf32>
    %18 = vector.shape_cast %17 : vector<1x6x64xf32> to vector<6x64xf32>
    %cst_21 = arith.constant dense<0.000000e+00> : vector<32x64xf32>
    %19 = tpu.matmul %1, %18, %cst_21 {dimension_numbers = #tpu.dot_dimension_numbers<[1], [0], [0], [1], [0, 0, 1, 1], [], []>} : vector<32x6xf32>, vector<6x64xf32>, vector<32x64xf32> -> vector<32x64xf32>
    %cst_22 = arith.constant dense<0.000000e+00> : vector<32x64xf32>
    %20 = tpu.matmul %3, %19, %cst_22 {dimension_numbers = #tpu.dot_dimension_numbers<[1], [0], [0], [1], [0, 0, 1, 1], [], []>} : vector<32x32xf32>, vector<32x64xf32>, vector<32x64xf32> -> vector<32x64xf32>
    %21 = arith.addf %16, %20 : vector<32x64xf32>
    %cst_23 = arith.constant dense<0.000000e+00> : vector<64xf32>
    %22 = vector.multi_reduction <add>, %21, %cst_23 [0] : vector<32x64xf32> to vector<64xf32>
    %23 = vector.shape_cast %22 : vector<64xf32> to vector<1x64xf32>
    %cst_24 = arith.constant 3.125000e-02 : f32
    %24 = vector.broadcast %cst_24 : f32 to vector<1x64xf32>
    %25 = arith.mulf %23, %24 : vector<1x64xf32>
    %26 = vector.broadcast %25 : vector<1x64xf32> to vector<32x64xf32>
    %27 = arith.subf %21, %26 : vector<32x64xf32>
    %28 = arith.mulf %27, %27 : vector<32x64xf32>
    %cst_25 = arith.constant dense<0.000000e+00> : vector<64xf32>
    %29 = vector.multi_reduction <add>, %28, %cst_25 [0] : vector<32x64xf32> to vector<64xf32>
    %30 = vector.shape_cast %29 : vector<64xf32> to vector<1x64xf32>
    %cst_26 = arith.constant 3.125000e-02 : f32
    %31 = vector.broadcast %cst_26 : f32 to vector<1x64xf32>
    %32 = arith.mulf %30, %31 : vector<1x64xf32>
    %cst_27 = arith.constant 9.99999974E-6 : f32
    %33 = vector.broadcast %cst_27 : f32 to vector<1x64xf32>
    %34 = arith.addf %32, %33 : vector<1x64xf32>
    %35 = math.rsqrt %34 : vector<1x64xf32>
    %36 = vector.broadcast %35 : vector<1x64xf32> to vector<32x64xf32>
    %37 = arith.mulf %27, %36 : vector<32x64xf32>
    %38 = vector.broadcast %5 : vector<1x64xf32> to vector<32x64xf32>
    %39 = arith.mulf %37, %38 : vector<32x64xf32>
    %40 = vector.broadcast %6 : vector<1x64xf32> to vector<32x64xf32>
    %41 = arith.addf %39, %40 : vector<32x64xf32>
    %cst_28 = arith.constant 0.000000e+00 : f32
    %42 = vector.broadcast %cst_28 : f32 to vector<32x64xf32>
    %43 = arith.maximumf %41, %42 : vector<32x64xf32>
    %44 = vector.shape_cast %43 : vector<32x64xf32> to vector<16x2x64xf32>
    %cst_29 = arith.constant dense<0xFF800000> : vector<16x64xf32>
    %45 = vector.multi_reduction <maximumf>, %44, %cst_29 [1] : vector<16x2x64xf32> to vector<16x64xf32>
    %c0_30 = arith.constant 0 : index
    %c0_31 = arith.constant 0 : index
    %46 = vector.load %arg4[%c0_30, %c0_31] : memref<16x16xf32, #tpu.memory_space<vmem>>, vector<16x16xf32>
    %c0_32 = arith.constant 0 : index
    %c0_33 = arith.constant 0 : index
    %47 = vector.load %arg5[%c0_32, %c0_33] : memref<16x16xf32, #tpu.memory_space<vmem>>, vector<16x16xf32>
    %c0_34 = arith.constant 0 : index
    %c0_35 = arith.constant 0 : index
    %48 = vector.load %arg11[%c0_34, %c0_35] : memref<1x64xf32, #tpu.memory_space<vmem>>, vector<1x64xf32>
    %c0_36 = arith.constant 0 : index
    %c0_37 = arith.constant 0 : index
    %49 = vector.load %arg12[%c0_36, %c0_37] : memref<1x64xf32, #tpu.memory_space<vmem>>, vector<1x64xf32>
    %c0_38 = arith.constant 0 : index
    %c0_39 = arith.constant 0 : index
    %50 = vector.load %arg13[%c0_38, %c0_39] : memref<1x64xf32, #tpu.memory_space<vmem>>, vector<1x64xf32>
    %c1_40 = arith.constant 1 : index
    %c0_41 = arith.constant 0 : index
    %c0_42 = arith.constant 0 : index
    %51 = vector.load %arg10[%c1_40, %c0_41, %c0_42] : memref<3x64x64xf32, #tpu.memory_space<vmem>>, vector<1x64x64xf32>
    %52 = vector.shape_cast %51 : vector<1x64x64xf32> to vector<64x64xf32>
    %cst_43 = arith.constant dense<0.000000e+00> : vector<16x64xf32>
    %53 = tpu.matmul %45, %52, %cst_43 {dimension_numbers = #tpu.dot_dimension_numbers<[1], [0], [0], [1], [0, 0, 1, 1], [], []>} : vector<16x64xf32>, vector<64x64xf32>, vector<16x64xf32> -> vector<16x64xf32>
    %54 = vector.broadcast %48 : vector<1x64xf32> to vector<16x64xf32>
    %55 = arith.addf %53, %54 : vector<16x64xf32>
    %c0_44 = arith.constant 0 : index
    %c0_45 = arith.constant 0 : index
    %c0_46 = arith.constant 0 : index
    %56 = vector.load %arg10[%c0_44, %c0_45, %c0_46] : memref<3x64x64xf32, #tpu.memory_space<vmem>>, vector<1x64x64xf32>
    %57 = vector.shape_cast %56 : vector<1x64x64xf32> to vector<64x64xf32>
    %cst_47 = arith.constant dense<0.000000e+00> : vector<16x64xf32>
    %58 = tpu.matmul %45, %57, %cst_47 {dimension_numbers = #tpu.dot_dimension_numbers<[1], [0], [0], [1], [0, 0, 1, 1], [], []>} : vector<16x64xf32>, vector<64x64xf32>, vector<16x64xf32> -> vector<16x64xf32>
    %cst_48 = arith.constant dense<0.000000e+00> : vector<16x64xf32>
    %59 = tpu.matmul %46, %58, %cst_48 {dimension_numbers = #tpu.dot_dimension_numbers<[1], [0], [0], [1], [0, 0, 1, 1], [], []>} : vector<16x16xf32>, vector<16x64xf32>, vector<16x64xf32> -> vector<16x64xf32>
    %60 = arith.addf %55, %59 : vector<16x64xf32>
    %c2_49 = arith.constant 2 : index
    %c0_50 = arith.constant 0 : index
    %c0_51 = arith.constant 0 : index
    %61 = vector.load %arg10[%c2_49, %c0_50, %c0_51] : memref<3x64x64xf32, #tpu.memory_space<vmem>>, vector<1x64x64xf32>
    %62 = vector.shape_cast %61 : vector<1x64x64xf32> to vector<64x64xf32>
    %cst_52 = arith.constant dense<0.000000e+00> : vector<16x64xf32>
    %63 = tpu.matmul %45, %62, %cst_52 {dimension_numbers = #tpu.dot_dimension_numbers<[1], [0], [0], [1], [0, 0, 1, 1], [], []>} : vector<16x64xf32>, vector<64x64xf32>, vector<16x64xf32> -> vector<16x64xf32>
    %cst_53 = arith.constant dense<0.000000e+00> : vector<16x64xf32>
    %64 = tpu.matmul %47, %63, %cst_53 {dimension_numbers = #tpu.dot_dimension_numbers<[1], [0], [0], [1], [0, 0, 1, 1], [], []>} : vector<16x16xf32>, vector<16x64xf32>, vector<16x64xf32> -> vector<16x64xf32>
    %65 = arith.addf %60, %64 : vector<16x64xf32>
    %cst_54 = arith.constant dense<0.000000e+00> : vector<64xf32>
    %66 = vector.multi_reduction <add>, %65, %cst_54 [0] : vector<16x64xf32> to vector<64xf32>
    %67 = vector.shape_cast %66 : vector<64xf32> to vector<1x64xf32>
    %cst_55 = arith.constant 6.250000e-02 : f32
    %68 = vector.broadcast %cst_55 : f32 to vector<1x64xf32>
    %69 = arith.mulf %67, %68 : vector<1x64xf32>
    %70 = vector.broadcast %69 : vector<1x64xf32> to vector<16x64xf32>
    %71 = arith.subf %65, %70 : vector<16x64xf32>
    %72 = arith.mulf %71, %71 : vector<16x64xf32>
    %cst_56 = arith.constant dense<0.000000e+00> : vector<64xf32>
    %73 = vector.multi_reduction <add>, %72, %cst_56 [0] : vector<16x64xf32> to vector<64xf32>
    %74 = vector.shape_cast %73 : vector<64xf32> to vector<1x64xf32>
    %cst_57 = arith.constant 6.250000e-02 : f32
    %75 = vector.broadcast %cst_57 : f32 to vector<1x64xf32>
    %76 = arith.mulf %74, %75 : vector<1x64xf32>
    %cst_58 = arith.constant 9.99999974E-6 : f32
    %77 = vector.broadcast %cst_58 : f32 to vector<1x64xf32>
    %78 = arith.addf %76, %77 : vector<1x64xf32>
    %79 = math.rsqrt %78 : vector<1x64xf32>
    %80 = vector.broadcast %79 : vector<1x64xf32> to vector<16x64xf32>
    %81 = arith.mulf %71, %80 : vector<16x64xf32>
    %82 = vector.broadcast %49 : vector<1x64xf32> to vector<16x64xf32>
    %83 = arith.mulf %81, %82 : vector<16x64xf32>
    %84 = vector.broadcast %50 : vector<1x64xf32> to vector<16x64xf32>
    %85 = arith.addf %83, %84 : vector<16x64xf32>
    %cst_59 = arith.constant 0.000000e+00 : f32
    %86 = vector.broadcast %cst_59 : f32 to vector<16x64xf32>
    %87 = arith.maximumf %85, %86 : vector<16x64xf32>
    %88 = vector.shape_cast %87 : vector<16x64xf32> to vector<8x2x64xf32>
    %cst_60 = arith.constant dense<0xFF800000> : vector<8x64xf32>
    %89 = vector.multi_reduction <maximumf>, %88, %cst_60 [1] : vector<8x2x64xf32> to vector<8x64xf32>
    %c0_61 = arith.constant 0 : index
    %c0_62 = arith.constant 0 : index
    %90 = vector.load %arg14[%c0_61, %c0_62] : memref<64x256xf32, #tpu.memory_space<vmem>>, vector<64x256xf32>
    %cst_63 = arith.constant dense<0.000000e+00> : vector<8x256xf32>
    %91 = tpu.matmul %89, %90, %cst_63 {dimension_numbers = #tpu.dot_dimension_numbers<[1], [0], [0], [1], [0, 0, 1, 1], [], []>} : vector<8x64xf32>, vector<64x256xf32>, vector<8x256xf32> -> vector<8x256xf32>
    %c0_64 = arith.constant 0 : index
    %c0_65 = arith.constant 0 : index
    %92 = vector.load %arg16[%c0_64, %c0_65] : memref<1x256xf32, #tpu.memory_space<vmem>>, vector<1x256xf32>
    %93 = vector.broadcast %92 : vector<1x256xf32> to vector<8x256xf32>
    %94 = arith.addf %91, %93 : vector<8x256xf32>
    %95 = vector.shape_cast %94 : vector<8x256xf32> to vector<2x4x256xf32>
    %c0_66 = arith.constant 0 : index
    %c0_67 = arith.constant 0 : index
    %96 = vector.load %arg15[%c0_66, %c0_67] : memref<64x256xf32, #tpu.memory_space<vmem>>, vector<64x256xf32>
    %cst_68 = arith.constant 0.000000e+00 : f32
    %97 = vector.broadcast %cst_68 : f32 to vector<2x64xf32>
    %cst_69 = arith.constant 0.000000e+00 : f32
    %98 = vector.broadcast %cst_69 : f32 to vector<2x64xf32>
    %99 = vector.extract_strided_slice %95 {offsets = [0, 0, 0], sizes = [2, 1, 256], strides = [1, 1, 1]} : vector<2x4x256xf32> to vector<2x1x256xf32>
    %100 = vector.shape_cast %99 : vector<2x1x256xf32> to vector<2x256xf32>
    %cst_70 = arith.constant dense<0.000000e+00> : vector<2x256xf32>
    %101 = tpu.matmul %97, %96, %cst_70 {dimension_numbers = #tpu.dot_dimension_numbers<[1], [0], [0], [1], [0, 0, 1, 1], [], []>} : vector<2x64xf32>, vector<64x256xf32>, vector<2x256xf32> -> vector<2x256xf32>
    %102 = arith.addf %100, %101 : vector<2x256xf32>
    %103 = vector.extract_strided_slice %102 {offsets = [0, 0], sizes = [2, 64], strides = [1, 1]} : vector<2x256xf32> to vector<2x64xf32>
    %cst_71 = arith.constant 0.000000e+00 : f32
    %104 = vector.broadcast %cst_71 : f32 to vector<2x64xf32>
    %105 = arith.subf %104, %103 : vector<2x64xf32>
    %106 = math.exp %105 : vector<2x64xf32>
    %cst_72 = arith.constant 1.000000e+00 : f32
    %107 = vector.broadcast %cst_72 : f32 to vector<2x64xf32>
    %108 = arith.addf %107, %106 : vector<2x64xf32>
    %cst_73 = arith.constant 1.000000e+00 : f32
    %109 = vector.broadcast %cst_73 : f32 to vector<2x64xf32>
    %110 = arith.divf %109, %108 : vector<2x64xf32>
    %111 = vector.extract_strided_slice %102 {offsets = [0, 64], sizes = [2, 64], strides = [1, 1]} : vector<2x256xf32> to vector<2x64xf32>
    %cst_74 = arith.constant 0.000000e+00 : f32
    %112 = vector.broadcast %cst_74 : f32 to vector<2x64xf32>
    %113 = arith.subf %112, %111 : vector<2x64xf32>
    %114 = math.exp %113 : vector<2x64xf32>
    %cst_75 = arith.constant 1.000000e+00 : f32
    %115 = vector.broadcast %cst_75 : f32 to vector<2x64xf32>
    %116 = arith.addf %115, %114 : vector<2x64xf32>
    %cst_76 = arith.constant 1.000000e+00 : f32
    %117 = vector.broadcast %cst_76 : f32 to vector<2x64xf32>
    %118 = arith.divf %117, %116 : vector<2x64xf32>
    %119 = vector.extract_strided_slice %102 {offsets = [0, 128], sizes = [2, 64], strides = [1, 1]} : vector<2x256xf32> to vector<2x64xf32>
    %120 = math.tanh %119 : vector<2x64xf32>
    %121 = vector.extract_strided_slice %102 {offsets = [0, 192], sizes = [2, 64], strides = [1, 1]} : vector<2x256xf32> to vector<2x64xf32>
    %cst_77 = arith.constant 0.000000e+00 : f32
    %122 = vector.broadcast %cst_77 : f32 to vector<2x64xf32>
    %123 = arith.subf %122, %121 : vector<2x64xf32>
    %124 = math.exp %123 : vector<2x64xf32>
    %cst_78 = arith.constant 1.000000e+00 : f32
    %125 = vector.broadcast %cst_78 : f32 to vector<2x64xf32>
    %126 = arith.addf %125, %124 : vector<2x64xf32>
    %cst_79 = arith.constant 1.000000e+00 : f32
    %127 = vector.broadcast %cst_79 : f32 to vector<2x64xf32>
    %128 = arith.divf %127, %126 : vector<2x64xf32>
    %129 = arith.mulf %118, %98 : vector<2x64xf32>
    %130 = arith.mulf %110, %120 : vector<2x64xf32>
    %131 = arith.addf %129, %130 : vector<2x64xf32>
    %132 = math.tanh %131 : vector<2x64xf32>
    %133 = arith.mulf %128, %132 : vector<2x64xf32>
    %c0_80 = arith.constant 0 : index
    %c0_81 = arith.constant 0 : index
    %c0_82 = arith.constant 0 : index
    %134 = vector.load %arg21[%c0_80, %c0_81, %c0_82] : memref<4x2x64xf32, #tpu.memory_space<vmem>>, vector<1x2x64xf32>
    %135 = vector.shape_cast %134 : vector<1x2x64xf32> to vector<2x64xf32>
    %136 = vector.shape_cast %133 : vector<2x64xf32> to vector<1x2x64xf32>
    tpu.vector_store %arg21[%c0_80, %c0_81, %c0_82], %136 {strides = array<i32>} : memref<4x2x64xf32, #tpu.memory_space<vmem>>, vector<1x2x64xf32>,
    %137 = vector.extract_strided_slice %95 {offsets = [0, 1, 0], sizes = [2, 1, 256], strides = [1, 1, 1]} : vector<2x4x256xf32> to vector<2x1x256xf32>
    %138 = vector.shape_cast %137 : vector<2x1x256xf32> to vector<2x256xf32>
    %cst_83 = arith.constant dense<0.000000e+00> : vector<2x256xf32>
    %139 = tpu.matmul %133, %96, %cst_83 {dimension_numbers = #tpu.dot_dimension_numbers<[1], [0], [0], [1], [0, 0, 1, 1], [], []>} : vector<2x64xf32>, vector<64x256xf32>, vector<2x256xf32> -> vector<2x256xf32>
    %140 = arith.addf %138, %139 : vector<2x256xf32>
    %141 = vector.extract_strided_slice %140 {offsets = [0, 0], sizes = [2, 64], strides = [1, 1]} : vector<2x256xf32> to vector<2x64xf32>
    %cst_84 = arith.constant 0.000000e+00 : f32
    %142 = vector.broadcast %cst_84 : f32 to vector<2x64xf32>
    %143 = arith.subf %142, %141 : vector<2x64xf32>
    %144 = math.exp %143 : vector<2x64xf32>
    %cst_85 = arith.constant 1.000000e+00 : f32
    %145 = vector.broadcast %cst_85 : f32 to vector<2x64xf32>
    %146 = arith.addf %145, %144 : vector<2x64xf32>
    %cst_86 = arith.constant 1.000000e+00 : f32
    %147 = vector.broadcast %cst_86 : f32 to vector<2x64xf32>
    %148 = arith.divf %147, %146 : vector<2x64xf32>
    %149 = vector.extract_strided_slice %140 {offsets = [0, 64], sizes = [2, 64], strides = [1, 1]} : vector<2x256xf32> to vector<2x64xf32>
    %cst_87 = arith.constant 0.000000e+00 : f32
    %150 = vector.broadcast %cst_87 : f32 to vector<2x64xf32>
    %151 = arith.subf %150, %149 : vector<2x64xf32>
    %152 = math.exp %151 : vector<2x64xf32>
    %cst_88 = arith.constant 1.000000e+00 : f32
    %153 = vector.broadcast %cst_88 : f32 to vector<2x64xf32>
    %154 = arith.addf %153, %152 : vector<2x64xf32>
    %cst_89 = arith.constant 1.000000e+00 : f32
    %155 = vector.broadcast %cst_89 : f32 to vector<2x64xf32>
    %156 = arith.divf %155, %154 : vector<2x64xf32>
    %157 = vector.extract_strided_slice %140 {offsets = [0, 128], sizes = [2, 64], strides = [1, 1]} : vector<2x256xf32> to vector<2x64xf32>
    %158 = math.tanh %157 : vector<2x64xf32>
    %159 = vector.extract_strided_slice %140 {offsets = [0, 192], sizes = [2, 64], strides = [1, 1]} : vector<2x256xf32> to vector<2x64xf32>
    %cst_90 = arith.constant 0.000000e+00 : f32
    %160 = vector.broadcast %cst_90 : f32 to vector<2x64xf32>
    %161 = arith.subf %160, %159 : vector<2x64xf32>
    %162 = math.exp %161 : vector<2x64xf32>
    %cst_91 = arith.constant 1.000000e+00 : f32
    %163 = vector.broadcast %cst_91 : f32 to vector<2x64xf32>
    %164 = arith.addf %163, %162 : vector<2x64xf32>
    %cst_92 = arith.constant 1.000000e+00 : f32
    %165 = vector.broadcast %cst_92 : f32 to vector<2x64xf32>
    %166 = arith.divf %165, %164 : vector<2x64xf32>
    %167 = arith.mulf %156, %131 : vector<2x64xf32>
    %168 = arith.mulf %148, %158 : vector<2x64xf32>
    %169 = arith.addf %167, %168 : vector<2x64xf32>
    %170 = math.tanh %169 : vector<2x64xf32>
    %171 = arith.mulf %166, %170 : vector<2x64xf32>
    %c1_93 = arith.constant 1 : index
    %c0_94 = arith.constant 0 : index
    %c0_95 = arith.constant 0 : index
    %172 = vector.load %arg21[%c1_93, %c0_94, %c0_95] : memref<4x2x64xf32, #tpu.memory_space<vmem>>, vector<1x2x64xf32>
    %173 = vector.shape_cast %172 : vector<1x2x64xf32> to vector<2x64xf32>
    %174 = vector.shape_cast %171 : vector<2x64xf32> to vector<1x2x64xf32>
    tpu.vector_store %arg21[%c1_93, %c0_94, %c0_95], %174 {strides = array<i32>} : memref<4x2x64xf32, #tpu.memory_space<vmem>>, vector<1x2x64xf32>,
    %175 = vector.extract_strided_slice %95 {offsets = [0, 2, 0], sizes = [2, 1, 256], strides = [1, 1, 1]} : vector<2x4x256xf32> to vector<2x1x256xf32>
    %176 = vector.shape_cast %175 : vector<2x1x256xf32> to vector<2x256xf32>
    %cst_96 = arith.constant dense<0.000000e+00> : vector<2x256xf32>
    %177 = tpu.matmul %171, %96, %cst_96 {dimension_numbers = #tpu.dot_dimension_numbers<[1], [0], [0], [1], [0, 0, 1, 1], [], []>} : vector<2x64xf32>, vector<64x256xf32>, vector<2x256xf32> -> vector<2x256xf32>
    %178 = arith.addf %176, %177 : vector<2x256xf32>
    %179 = vector.extract_strided_slice %178 {offsets = [0, 0], sizes = [2, 64], strides = [1, 1]} : vector<2x256xf32> to vector<2x64xf32>
    %cst_97 = arith.constant 0.000000e+00 : f32
    %180 = vector.broadcast %cst_97 : f32 to vector<2x64xf32>
    %181 = arith.subf %180, %179 : vector<2x64xf32>
    %182 = math.exp %181 : vector<2x64xf32>
    %cst_98 = arith.constant 1.000000e+00 : f32
    %183 = vector.broadcast %cst_98 : f32 to vector<2x64xf32>
    %184 = arith.addf %183, %182 : vector<2x64xf32>
    %cst_99 = arith.constant 1.000000e+00 : f32
    %185 = vector.broadcast %cst_99 : f32 to vector<2x64xf32>
    %186 = arith.divf %185, %184 : vector<2x64xf32>
    %187 = vector.extract_strided_slice %178 {offsets = [0, 64], sizes = [2, 64], strides = [1, 1]} : vector<2x256xf32> to vector<2x64xf32>
    %cst_100 = arith.constant 0.000000e+00 : f32
    %188 = vector.broadcast %cst_100 : f32 to vector<2x64xf32>
    %189 = arith.subf %188, %187 : vector<2x64xf32>
    %190 = math.exp %189 : vector<2x64xf32>
    %cst_101 = arith.constant 1.000000e+00 : f32
    %191 = vector.broadcast %cst_101 : f32 to vector<2x64xf32>
    %192 = arith.addf %191, %190 : vector<2x64xf32>
    %cst_102 = arith.constant 1.000000e+00 : f32
    %193 = vector.broadcast %cst_102 : f32 to vector<2x64xf32>
    %194 = arith.divf %193, %192 : vector<2x64xf32>
    %195 = vector.extract_strided_slice %178 {offsets = [0, 128], sizes = [2, 64], strides = [1, 1]} : vector<2x256xf32> to vector<2x64xf32>
    %196 = math.tanh %195 : vector<2x64xf32>
    %197 = vector.extract_strided_slice %178 {offsets = [0, 192], sizes = [2, 64], strides = [1, 1]} : vector<2x256xf32> to vector<2x64xf32>
    %cst_103 = arith.constant 0.000000e+00 : f32
    %198 = vector.broadcast %cst_103 : f32 to vector<2x64xf32>
    %199 = arith.subf %198, %197 : vector<2x64xf32>
    %200 = math.exp %199 : vector<2x64xf32>
    %cst_104 = arith.constant 1.000000e+00 : f32
    %201 = vector.broadcast %cst_104 : f32 to vector<2x64xf32>
    %202 = arith.addf %201, %200 : vector<2x64xf32>
    %cst_105 = arith.constant 1.000000e+00 : f32
    %203 = vector.broadcast %cst_105 : f32 to vector<2x64xf32>
    %204 = arith.divf %203, %202 : vector<2x64xf32>
    %205 = arith.mulf %194, %169 : vector<2x64xf32>
    %206 = arith.mulf %186, %196 : vector<2x64xf32>
    %207 = arith.addf %205, %206 : vector<2x64xf32>
    %208 = math.tanh %207 : vector<2x64xf32>
    %209 = arith.mulf %204, %208 : vector<2x64xf32>
    %c2_106 = arith.constant 2 : index
    %c0_107 = arith.constant 0 : index
    %c0_108 = arith.constant 0 : index
    %210 = vector.load %arg21[%c2_106, %c0_107, %c0_108] : memref<4x2x64xf32, #tpu.memory_space<vmem>>, vector<1x2x64xf32>
    %211 = vector.shape_cast %210 : vector<1x2x64xf32> to vector<2x64xf32>
    %212 = vector.shape_cast %209 : vector<2x64xf32> to vector<1x2x64xf32>
    tpu.vector_store %arg21[%c2_106, %c0_107, %c0_108], %212 {strides = array<i32>} : memref<4x2x64xf32, #tpu.memory_space<vmem>>, vector<1x2x64xf32>,
    %213 = vector.extract_strided_slice %95 {offsets = [0, 3, 0], sizes = [2, 1, 256], strides = [1, 1, 1]} : vector<2x4x256xf32> to vector<2x1x256xf32>
    %214 = vector.shape_cast %213 : vector<2x1x256xf32> to vector<2x256xf32>
    %cst_109 = arith.constant dense<0.000000e+00> : vector<2x256xf32>
    %215 = tpu.matmul %209, %96, %cst_109 {dimension_numbers = #tpu.dot_dimension_numbers<[1], [0], [0], [1], [0, 0, 1, 1], [], []>} : vector<2x64xf32>, vector<64x256xf32>, vector<2x256xf32> -> vector<2x256xf32>
    %216 = arith.addf %214, %215 : vector<2x256xf32>
    %217 = vector.extract_strided_slice %216 {offsets = [0, 0], sizes = [2, 64], strides = [1, 1]} : vector<2x256xf32> to vector<2x64xf32>
    %cst_110 = arith.constant 0.000000e+00 : f32
    %218 = vector.broadcast %cst_110 : f32 to vector<2x64xf32>
    %219 = arith.subf %218, %217 : vector<2x64xf32>
    %220 = math.exp %219 : vector<2x64xf32>
    %cst_111 = arith.constant 1.000000e+00 : f32
    %221 = vector.broadcast %cst_111 : f32 to vector<2x64xf32>
    %222 = arith.addf %221, %220 : vector<2x64xf32>
    %cst_112 = arith.constant 1.000000e+00 : f32
    %223 = vector.broadcast %cst_112 : f32 to vector<2x64xf32>
    %224 = arith.divf %223, %222 : vector<2x64xf32>
    %225 = vector.extract_strided_slice %216 {offsets = [0, 64], sizes = [2, 64], strides = [1, 1]} : vector<2x256xf32> to vector<2x64xf32>
    %cst_113 = arith.constant 0.000000e+00 : f32
    %226 = vector.broadcast %cst_113 : f32 to vector<2x64xf32>
    %227 = arith.subf %226, %225 : vector<2x64xf32>
    %228 = math.exp %227 : vector<2x64xf32>
    %cst_114 = arith.constant 1.000000e+00 : f32
    %229 = vector.broadcast %cst_114 : f32 to vector<2x64xf32>
    %230 = arith.addf %229, %228 : vector<2x64xf32>
    %cst_115 = arith.constant 1.000000e+00 : f32
    %231 = vector.broadcast %cst_115 : f32 to vector<2x64xf32>
    %232 = arith.divf %231, %230 : vector<2x64xf32>
    %233 = vector.extract_strided_slice %216 {offsets = [0, 128], sizes = [2, 64], strides = [1, 1]} : vector<2x256xf32> to vector<2x64xf32>
    %234 = math.tanh %233 : vector<2x64xf32>
    %235 = vector.extract_strided_slice %216 {offsets = [0, 192], sizes = [2, 64], strides = [1, 1]} : vector<2x256xf32> to vector<2x64xf32>
    %cst_116 = arith.constant 0.000000e+00 : f32
    %236 = vector.broadcast %cst_116 : f32 to vector<2x64xf32>
    %237 = arith.subf %236, %235 : vector<2x64xf32>
    %238 = math.exp %237 : vector<2x64xf32>
    %cst_117 = arith.constant 1.000000e+00 : f32
    %239 = vector.broadcast %cst_117 : f32 to vector<2x64xf32>
    %240 = arith.addf %239, %238 : vector<2x64xf32>
    %cst_118 = arith.constant 1.000000e+00 : f32
    %241 = vector.broadcast %cst_118 : f32 to vector<2x64xf32>
    %242 = arith.divf %241, %240 : vector<2x64xf32>
    %243 = arith.mulf %232, %207 : vector<2x64xf32>
    %244 = arith.mulf %224, %234 : vector<2x64xf32>
    %245 = arith.addf %243, %244 : vector<2x64xf32>
    %246 = math.tanh %245 : vector<2x64xf32>
    %247 = arith.mulf %242, %246 : vector<2x64xf32>
    %c3 = arith.constant 3 : index
    %c0_119 = arith.constant 0 : index
    %c0_120 = arith.constant 0 : index
    %248 = vector.load %arg21[%c3, %c0_119, %c0_120] : memref<4x2x64xf32, #tpu.memory_space<vmem>>, vector<1x2x64xf32>
    %249 = vector.shape_cast %248 : vector<1x2x64xf32> to vector<2x64xf32>
    %250 = vector.shape_cast %247 : vector<2x64xf32> to vector<1x2x64xf32>
    tpu.vector_store %arg21[%c3, %c0_119, %c0_120], %250 {strides = array<i32>} : memref<4x2x64xf32, #tpu.memory_space<vmem>>, vector<1x2x64xf32>,
    %c0_121 = arith.constant 0 : index
    %c0_122 = arith.constant 0 : index
    %c0_123 = arith.constant 0 : index
    %251 = vector.load %arg21[%c0_121, %c0_122, %c0_123] : memref<4x2x64xf32, #tpu.memory_space<vmem>>, vector<4x2x64xf32>
    %c0_124 = arith.constant 0 : index
    %c0_125 = arith.constant 0 : index
    %252 = vector.load %arg19[%c0_124, %c0_125] : memref<16x4xf32, #tpu.memory_space<vmem>>, vector<16x4xf32>
    %c0_126 = arith.constant 0 : index
    %c0_127 = arith.constant 0 : index
    %253 = vector.load %arg17[%c0_126, %c0_127] : memref<64x5xf32, #tpu.memory_space<vmem>>, vector<64x5xf32>
    %c0_128 = arith.constant 0 : index
    %c0_129 = arith.constant 0 : index
    %254 = vector.load %arg18[%c0_128, %c0_129] : memref<1x5xf32, #tpu.memory_space<vmem>>, vector<1x5xf32>
    %255 = vector.extract_strided_slice %251 {offsets = [0, 0, 0], sizes = [4, 1, 64], strides = [1, 1, 1]} : vector<4x2x64xf32> to vector<4x1x64xf32>
    %256 = vector.shape_cast %255 : vector<4x1x64xf32> to vector<4x64xf32>
    %cst_130 = arith.constant dense<0.000000e+00> : vector<16x64xf32>
    %257 = tpu.matmul %252, %256, %cst_130 {dimension_numbers = #tpu.dot_dimension_numbers<[1], [0], [0], [1], [0, 0, 1, 1], [], []>} : vector<16x4xf32>, vector<4x64xf32>, vector<16x64xf32> -> vector<16x64xf32>
    %cst_131 = arith.constant dense<0.000000e+00> : vector<16x5xf32>
    %258 = tpu.matmul %257, %253, %cst_131 {dimension_numbers = #tpu.dot_dimension_numbers<[1], [0], [0], [1], [0, 0, 1, 1], [], []>} : vector<16x64xf32>, vector<64x5xf32>, vector<16x5xf32> -> vector<16x5xf32>
    %259 = vector.broadcast %254 : vector<1x5xf32> to vector<16x5xf32>
    %260 = arith.addf %258, %259 : vector<16x5xf32>
    %c0_132 = arith.constant 0 : index
    %c0_133 = arith.constant 0 : index
    %c0_134 = arith.constant 0 : index
    %261 = vector.load %arg20[%c0_132, %c0_133, %c0_134] : memref<2x16x5xf32, #tpu.memory_space<vmem>>, vector<1x16x5xf32>
    %262 = vector.shape_cast %261 : vector<1x16x5xf32> to vector<16x5xf32>
    %263 = vector.shape_cast %260 : vector<16x5xf32> to vector<1x16x5xf32>
    tpu.vector_store %arg20[%c0_132, %c0_133, %c0_134], %263 {strides = array<i32>} : memref<2x16x5xf32, #tpu.memory_space<vmem>>, vector<1x16x5xf32>,
    %264 = vector.extract_strided_slice %251 {offsets = [0, 1, 0], sizes = [4, 1, 64], strides = [1, 1, 1]} : vector<4x2x64xf32> to vector<4x1x64xf32>
    %265 = vector.shape_cast %264 : vector<4x1x64xf32> to vector<4x64xf32>
    %cst_135 = arith.constant dense<0.000000e+00> : vector<16x64xf32>
    %266 = tpu.matmul %252, %265, %cst_135 {dimension_numbers = #tpu.dot_dimension_numbers<[1], [0], [0], [1], [0, 0, 1, 1], [], []>} : vector<16x4xf32>, vector<4x64xf32>, vector<16x64xf32> -> vector<16x64xf32>
    %cst_136 = arith.constant dense<0.000000e+00> : vector<16x5xf32>
    %267 = tpu.matmul %266, %253, %cst_136 {dimension_numbers = #tpu.dot_dimension_numbers<[1], [0], [0], [1], [0, 0, 1, 1], [], []>} : vector<16x64xf32>, vector<64x5xf32>, vector<16x5xf32> -> vector<16x5xf32>
    %268 = vector.broadcast %254 : vector<1x5xf32> to vector<16x5xf32>
    %269 = arith.addf %267, %268 : vector<16x5xf32>
    %c1_137 = arith.constant 1 : index
    %c0_138 = arith.constant 0 : index
    %c0_139 = arith.constant 0 : index
    %270 = vector.load %arg20[%c1_137, %c0_138, %c0_139] : memref<2x16x5xf32, #tpu.memory_space<vmem>>, vector<1x16x5xf32>
    %271 = vector.shape_cast %270 : vector<1x16x5xf32> to vector<16x5xf32>
    %272 = vector.shape_cast %269 : vector<16x5xf32> to vector<1x16x5xf32>
    tpu.vector_store %arg20[%c1_137, %c0_138, %c0_139], %272 {strides = array<i32>} : memref<2x16x5xf32, #tpu.memory_space<vmem>>, vector<1x16x5xf32>,
    return
  }
  func.func @transform_0(%arg0: i32) -> (i32, i32, i32) {
    %c0_i32 = arith.constant 0 : i32
    %c0_i32_0 = arith.constant 0 : i32
    %c0_i32_1 = arith.constant 0 : i32
    %c0_i32_2 = arith.constant 0 : i32
    return %c0_i32, %c0_i32_0, %c0_i32_1 : i32, i32, i32
  }
  func.func @transform_1(%arg0: i32) -> (i32, i32) {
    %c0_i32 = arith.constant 0 : i32
    %c0_i32_0 = arith.constant 0 : i32
    %c0_i32_1 = arith.constant 0 : i32
    return %c0_i32, %c0_i32_0 : i32, i32
  }
  func.func @transform_2(%arg0: i32) -> (i32, i32) {
    %c0_i32 = arith.constant 0 : i32
    %c0_i32_0 = arith.constant 0 : i32
    %c0_i32_1 = arith.constant 0 : i32
    return %c0_i32, %c0_i32_0 : i32, i32
  }
  func.func @transform_3(%arg0: i32) -> (i32, i32) {
    %c0_i32 = arith.constant 0 : i32
    %c0_i32_0 = arith.constant 0 : i32
    %c0_i32_1 = arith.constant 0 : i32
    return %c0_i32, %c0_i32_0 : i32, i32
  }
  func.func @transform_4(%arg0: i32) -> (i32, i32) {
    %c0_i32 = arith.constant 0 : i32
    %c0_i32_0 = arith.constant 0 : i32
    %c0_i32_1 = arith.constant 0 : i32
    return %c0_i32, %c0_i32_0 : i32, i32
  }
  func.func @transform_5(%arg0: i32) -> (i32, i32, i32) {
    %c0_i32 = arith.constant 0 : i32
    %c0_i32_0 = arith.constant 0 : i32
    %c0_i32_1 = arith.constant 0 : i32
    %c0_i32_2 = arith.constant 0 : i32
    return %c0_i32, %c0_i32_0, %c0_i32_1 : i32, i32, i32
  }
  func.func @transform_6(%arg0: i32) -> (i32, i32) {
    %c0_i32 = arith.constant 0 : i32
    %c0_i32_0 = arith.constant 0 : i32
    %c0_i32_1 = arith.constant 0 : i32
    return %c0_i32, %c0_i32_0 : i32, i32
  }
  func.func @transform_7(%arg0: i32) -> (i32, i32) {
    %c0_i32 = arith.constant 0 : i32
    %c0_i32_0 = arith.constant 0 : i32
    %c0_i32_1 = arith.constant 0 : i32
    return %c0_i32, %c0_i32_0 : i32, i32
  }
  func.func @transform_8(%arg0: i32) -> (i32, i32) {
    %c0_i32 = arith.constant 0 : i32
    %c0_i32_0 = arith.constant 0 : i32
    %c0_i32_1 = arith.constant 0 : i32
    return %c0_i32, %c0_i32_0 : i32, i32
  }
  func.func @transform_9(%arg0: i32) -> (i32, i32, i32) {
    %c0_i32 = arith.constant 0 : i32
    %c0_i32_0 = arith.constant 0 : i32
    %c0_i32_1 = arith.constant 0 : i32
    %c0_i32_2 = arith.constant 0 : i32
    return %c0_i32, %c0_i32_0, %c0_i32_1 : i32, i32, i32
  }
  func.func @transform_10(%arg0: i32) -> (i32, i32) {
    %c0_i32 = arith.constant 0 : i32
    %c0_i32_0 = arith.constant 0 : i32
    %c0_i32_1 = arith.constant 0 : i32
    return %c0_i32, %c0_i32_0 : i32, i32
  }
  func.func @transform_11(%arg0: i32) -> (i32, i32) {
    %c0_i32 = arith.constant 0 : i32
    %c0_i32_0 = arith.constant 0 : i32
    %c0_i32_1 = arith.constant 0 : i32
    return %c0_i32, %c0_i32_0 : i32, i32
  }
  func.func @transform_12(%arg0: i32) -> (i32, i32) {
    %c0_i32 = arith.constant 0 : i32
    %c0_i32_0 = arith.constant 0 : i32
    %c0_i32_1 = arith.constant 0 : i32
    return %c0_i32, %c0_i32_0 : i32, i32
  }
  func.func @transform_13(%arg0: i32) -> (i32, i32) {
    %c0_i32 = arith.constant 0 : i32
    %c0_i32_0 = arith.constant 0 : i32
    %c0_i32_1 = arith.constant 0 : i32
    return %c0_i32, %c0_i32_0 : i32, i32
  }
  func.func @transform_14(%arg0: i32) -> (i32, i32) {
    %c0_i32 = arith.constant 0 : i32
    %c0_i32_0 = arith.constant 0 : i32
    %c0_i32_1 = arith.constant 0 : i32
    return %c0_i32, %c0_i32_0 : i32, i32
  }
  func.func @transform_15(%arg0: i32) -> (i32, i32) {
    %c0_i32 = arith.constant 0 : i32
    %c0_i32_0 = arith.constant 0 : i32
    %c0_i32_1 = arith.constant 0 : i32
    return %c0_i32, %c0_i32_0 : i32, i32
  }
  func.func @transform_16(%arg0: i32) -> (i32, i32) {
    %c0_i32 = arith.constant 0 : i32
    %c0_i32_0 = arith.constant 0 : i32
    %c0_i32_1 = arith.constant 0 : i32
    return %c0_i32, %c0_i32_0 : i32, i32
  }
  func.func @transform_17(%arg0: i32) -> (i32, i32) {
    %c0_i32 = arith.constant 0 : i32
    %c0_i32_0 = arith.constant 0 : i32
    %c0_i32_1 = arith.constant 0 : i32
    return %c0_i32, %c0_i32_0 : i32, i32
  }
  func.func @transform_18(%arg0: i32) -> (i32, i32) {
    %c0_i32 = arith.constant 0 : i32
    %c0_i32_0 = arith.constant 0 : i32
    %c0_i32_1 = arith.constant 0 : i32
    return %c0_i32, %c0_i32_0 : i32, i32
  }
  func.func @transform_19(%arg0: i32) -> (i32, i32, i32) {
    %c0_i32 = arith.constant 0 : i32
    %c0_i32_0 = arith.constant 0 : i32
    %c0_i32_1 = arith.constant 0 : i32
    %c0_i32_2 = arith.constant 0 : i32
    return %c0_i32, %c0_i32_0, %c0_i32_1 : i32, i32, i32
  }
}

</mosaic_0001>

<bundles_post_ra>
// kernel: tpu_custom_call.1
= control target key start
LH: loop header
LB: loop body
LE: loop exit
PB: predicated region body
PF: predicated region fallthrough
CT: control target
= control target key end

     0   :  { %s4421_s0 = inlined_call_operand.vmem [shape: f32[2,16,6], index: 0, kind: input, shape index: {}]   ;;  %s4422_s1 = inlined_call_operand.vmem [shape: f32[32,32], index: 1, kind: input, shape index: {}]   ;;  %s4423_s2 = inlined_call_operand.hbm [shape: f32[32,32], index: 2, kind: input, shape index: {}]   ;;  %s4424_s3 = inlined_call_operand.hbm [shape: f32[16,16], index: 3, kind: input, shape index: {}]   ;;  %s4425_s4 = inlined_call_operand.hbm [shape: f32[16,16], index: 4, kind: input, shape index: {}]   ;;  %s4426_s5 = inlined_call_operand.vmem [shape: f32[3,6,64], index: 5, kind: input, shape index: {}]   ;;  %s4427_s6 = inlined_call_operand.hbm [shape: f32[1,64], index: 6, kind: input, shape index: {}]   ;;  %s4428_s7 = inlined_call_operand.hbm [shape: f32[1,64], index: 7, kind: input, shape index: {}]   ;;  %s4429_s8 = inlined_call_operand.hbm [shape: f32[1,64], index: 8, kind: input, shape index: {}]   ;;  %s4430_s9 = inlined_call_operand.hbm [shape: f32[3,64,64], index: 9, kind: input, shape index: {}]   ;;  %s4431_s10 = inlined_call_operand.hbm [shape: f32[1,64], index: 10, kind: input, shape index: {}]   ;;  %s4432_s11 = inlined_call_operand.hbm [shape: f32[1,64], index: 11, kind: input, shape index: {}]   ;;  %s4433_s12 = inlined_call_operand.hbm [shape: f32[1,64], index: 12, kind: input, shape index: {}]   ;;  %s4434_s13 = inlined_call_operand.vmem [shape: f32[64,256], index: 13, kind: input, shape index: {}]   ;;  %s4435_s14 = inlined_call_operand.hbm [shape: f32[64,256], index: 14, kind: input, shape index: {}]   ;;  %s4436_s15 = inlined_call_operand.hbm [shape: f32[1,256], index: 15, kind: input, shape index: {}]   ;;  %s4437_s16 = inlined_call_operand.vmem [shape: f32[64,5], index: 16, kind: input, shape index: {}]   ;;  %s4438_s17 = inlined_call_operand.vmem [shape: f32[1,5], index: 17, kind: input, shape index: {}]   ;;  %s4439_s18 = inlined_call_operand.vmem [shape: f32[16,4], index: 18, kind: input, shape index: {}]   ;;  %s4440_s19 = inlined_call_operand.vmem [shape: f32[2,16,5], index: 19, kind: output, shape index: {}]  }
   0x1   :  { %4447 = sst [smem:[#allocation29_spill]] %s4421_s0 }
   0x2   :  { %4448 = sst [smem:[#allocation30_spill]] %s4422_s1 }
   0x3   :  { %4449 = sst [smem:[#allocation31_spill]] %s4423_s2 }
   0x4   :  { %4450 = sst [smem:[#allocation32_spill]] %s4424_s3 }
   0x5   :  { %24 = vsyncpa [#allocation4], 0 }
   0x6   :  { %25 = vsyncpa [#allocation6], 0 }
   0x7   :  { %26 = vsyncpa [#allocation9], 0 }
   0x8   :  { %27 = vsyncpa [#allocation12], 0 }
   0x9   :  { %28 = vsyncpa [#allocation15], 0 }
   0xa   :  { %29 = vsyncpa [#allocation18], 0 }
   0xb   :  { %30 = vsyncpa [#allocation21], 0  ;;  %s3712_s0 = smov [#allocation5]   ;;  %s3713_s20 = smov [#allocation8]  }
   0xc   :  { %s52_s30 = sshll.u32 %s3712_s0, 4  ;;  %s79_s21 = sshll.u32 %s3713_s20, 4  ;;  %s53_s30 = int_to_ptr.vmem [resolvable:$true] %s52_s30  ;;  %s3831_s21 = int_to_ptr.vmem [resolvable:$true] %s79_s21 }
   0xd   :  { %s4451_s2 = sld [smem:[#allocation32_spill]] }
  0x13   :  { %s3434_s23 = scalar_lea.hbm %s4451_s2, 256 }
  0x14   :  { %p3435_p0 = scmp.ne.s32.totalorder %s4451_s2, %s3434_s23  ;;  %p3438_p1 = scmp.lt.u32.totalorder %s3434_s23, %s4451_s2 }
  0x16   :  { %p3440_p2 = pnand %p3438_p1, %p3435_p0 }
  0x18   :  { %3443 = shalt.err (!%p3440_p2)
}
  0x19   :  { %s3444_s27 = scalar_lea.vmem %s53_s30, 256  ;;  %p3449_p4 = scmp.lt.s32.totalorder %s53_s30, %s53_s30 }
  0x1a   :  { %p3445_p3 = scmp.ne.s32.totalorder %s53_s30, %s3444_s27  ;;  %p3450_p5 = scmp.lt.s32.totalorder %s3444_s27, %s3444_s27 }
  0x1c   :  { %p3451_p6 = por %p3450_p5, %p3449_p4 }
  0x1e   :  { %p3452_p7 = pnand %p3451_p6, %p3445_p3 }
  0x20   :  { %3455 = shalt.err (!%p3452_p7)
}
  0x21   :  { %s4445_s28 = smov 128   ;;  %s3715_s29 = smov 8  }
  0x22   :  { %58 = dma.hbm_to_vmem [thread:$0]  %s4451_s2, 256, %s53_s30, [#allocation6], %s4445_s28, %s4445_s28, %s3715_s29  }
  0x23   :  { %s3456_s23 = scalar_lea.hbm %s4427_s6, 16 }
  0x24   :  { %p3457_p8 = scmp.ne.s32.totalorder %s4427_s6, %s3456_s23  ;;  %p3460_p9 = scmp.lt.u32.totalorder %s3456_s23, %s4427_s6 }
  0x26   :  { %p3462_p10 = pnand %p3460_p9, %p3457_p8 }
  0x28   :  { %3465 = shalt.err (!%p3462_p10)
}
  0x29   :  { %s3466_s27 = scalar_lea.vmem %s3831_s21, 16  ;;  %s3470_s30 = scalar_lea.vmem %s3831_s21, 32 }
  0x2a   :  { %p3467_p11 = scmp.ne.s32.totalorder %s3831_s21, %s3466_s27  ;;  %p3471_p12 = scmp.lt.s32.totalorder %s3831_s21, %s3831_s21 }
  0x2b   :  { %p3472_p13 = scmp.lt.s32.totalorder %s3470_s30, %s3466_s27 }
  0x2d   :  { %p3473_p0 = por %p3472_p13, %p3471_p12 }
  0x2f   :  { %p3474_p1 = pnand %p3473_p0, %p3467_p11 }
  0x31   :  { %3477 = shalt.err (!%p3474_p1)
}
  0x32   :  { %82 = dma.hbm_to_vmem [thread:$0]  %s4427_s6, 16, %s3831_s21, [#allocation9]  }
  0x33   :  { %s3716_s20 = smov [#allocation11]   ;;  %s3717_s22 = smov [#allocation14]  }
  0x34   :  { %s99_s1 = sshll.u32 %s3716_s20, 4  ;;  %s121_s23 = sshll.u32 %s3717_s22, 4  ;;  %s100_s1 = int_to_ptr.vmem [resolvable:$true] %s99_s1  ;;  %s122_s23 = int_to_ptr.vmem [resolvable:$true] %s121_s23 }
  0x35   :  { %s3478_s3 = scalar_lea.hbm %s4429_s8, 16 }
  0x36   :  { %p3479_p2 = scmp.ne.s32.totalorder %s4429_s8, %s3478_s3  ;;  %p3482_p3 = scmp.lt.u32.totalorder %s3478_s3, %s4429_s8 }
  0x38   :  { %p3484_p4 = pnand %p3482_p3, %p3479_p2 }
  0x3a   :  { %3487 = shalt.err (!%p3484_p4)
}
  0x3b   :  { %s3488_s6 = scalar_lea.vmem %s100_s1, 16  ;;  %s3492_s21 = scalar_lea.vmem %s100_s1, 32 }
  0x3c   :  { %p3489_p5 = scmp.ne.s32.totalorder %s100_s1, %s3488_s6  ;;  %p3493_p6 = scmp.lt.s32.totalorder %s100_s1, %s100_s1 }
  0x3d   :  { %p3494_p7 = scmp.lt.s32.totalorder %s3492_s21, %s3488_s6 }
  0x3f   :  { %p3495_p8 = por %p3494_p7, %p3493_p6 }
  0x41   :  { %p3496_p9 = pnand %p3495_p8, %p3489_p5 }
  0x43   :  { %3499 = shalt.err (!%p3496_p9)
}
  0x44   :  { %102 = dma.hbm_to_vmem [thread:$0]  %s4429_s8, 16, %s100_s1, [#allocation12]  }
  0x45   :  { %s3500_s24 = scalar_lea.hbm %s4431_s10, 16 }
  0x46   :  { %p3501_p10 = scmp.ne.s32.totalorder %s4431_s10, %s3500_s24  ;;  %p3504_p11 = scmp.lt.u32.totalorder %s3500_s24, %s4431_s10 }
  0x48   :  { %p3506_p12 = pnand %p3504_p11, %p3501_p10 }
  0x4a   :  { %3509 = shalt.err (!%p3506_p12)
}
  0x4b   :  { %s3510_s27 = scalar_lea.vmem %s122_s23, 16  ;;  %s3514_s30 = scalar_lea.vmem %s122_s23, 32 }
  0x4c   :  { %p3511_p13 = scmp.ne.s32.totalorder %s122_s23, %s3510_s27  ;;  %p3515_p0 = scmp.lt.s32.totalorder %s122_s23, %s122_s23 }
  0x4d   :  { %p3516_p1 = scmp.lt.s32.totalorder %s3514_s30, %s3510_s27 }
  0x4f   :  { %p3517_p2 = por %p3516_p1, %p3515_p0 }
  0x51   :  { %p3518_p3 = pnand %p3517_p2, %p3511_p13 }
  0x53   :  { %3521 = shalt.err (!%p3518_p3)
}
  0x54   :  { %124 = dma.hbm_to_vmem [thread:$0]  %s4431_s10, 16, %s122_s23, [#allocation15]  }
  0x55   :  { %s3718_s6 = smov [#allocation17]   ;;  %s3719_s2 = smov [#allocation3]  }
  0x56   :  { %s141_s21 = sshll.u32 %s3718_s6, 4  ;;  %s40_s0 = sshll.u32 %s3719_s2, 4  ;;  %s142_s21 = int_to_ptr.vmem [resolvable:$true] %s141_s21  ;;  %s3890_s0 = int_to_ptr.vmem [resolvable:$true] %s40_s0 }
  0x57   :  { %s3522_s24 = scalar_lea.hbm %s4433_s12, 16 }
  0x58   :  { %p3523_p4 = scmp.ne.s32.totalorder %s4433_s12, %s3522_s24  ;;  %p3526_p5 = scmp.lt.u32.totalorder %s3522_s24, %s4433_s12 }
  0x5a   :  { %p3528_p6 = pnand %p3526_p5, %p3523_p4 }
  0x5c   :  { %3531 = shalt.err (!%p3528_p6)
}
  0x5d   :  { %s3532_s10 = scalar_lea.vmem %s142_s21, 16  ;;  %s3536_s23 = scalar_lea.vmem %s142_s21, 32 }
  0x5e   :  { %p3533_p7 = scmp.ne.s32.totalorder %s142_s21, %s3532_s10  ;;  %p3537_p8 = scmp.lt.s32.totalorder %s142_s21, %s142_s21 }
  0x5f   :  { %p3538_p9 = scmp.lt.s32.totalorder %s3536_s23, %s3532_s10 }
  0x61   :  { %p3539_p10 = por %p3538_p9, %p3537_p8 }
  0x63   :  { %p3540_p11 = pnand %p3539_p10, %p3533_p7 }
  0x65   :  { %3543 = shalt.err (!%p3540_p11)
}
  0x66   :  { %144 = dma.hbm_to_vmem [thread:$0]  %s4433_s12, 16, %s142_s21, [#allocation18]  }
  0x67   :  { %s4452_s6 = sld [smem:[#allocation31_spill]] }
  0x6d   :  { %s3544_s2 = scalar_lea.hbm %s4452_s6, 512 }
  0x6e   :  { %p3545_p12 = scmp.ne.s32.totalorder %s4452_s6, %s3544_s2  ;;  %p3548_p13 = scmp.lt.u32.totalorder %s3544_s2, %s4452_s6 }
  0x70   :  { %p3550_p0 = pnand %p3548_p13, %p3545_p12 }
  0x72   :  { %3553 = shalt.err (!%p3550_p0)
}
  0x73   :  { %s3554_s25 = scalar_lea.vmem %s3890_s0, 512  ;;  %p3559_p2 = scmp.lt.s32.totalorder %s3890_s0, %s3890_s0 }
  0x74   :  { %p3555_p1 = scmp.ne.s32.totalorder %s3890_s0, %s3554_s25  ;;  %p3560_p3 = scmp.lt.s32.totalorder %s3554_s25, %s3554_s25 }
  0x76   :  { %p3561_p4 = por %p3560_p3, %p3559_p2 }
  0x78   :  { %p3562_p5 = pnand %p3561_p4, %p3555_p1 }
  0x7a   :  { %3565 = shalt.err (!%p3562_p5)
}
  0x7b   :  { %s4453_s12 = smov 128   ;;  %s3720_s26 = smov [#allocation7]  }
  0x7c   :  { %46 = dma.hbm_to_vmem [thread:$0]  %s4452_s6, 512, %s3890_s0, [#allocation4], %s4453_s12, %s4453_s12, %s3715_s29  }
  0x7d   :  { %s64_s10 = sshll.u32 %s3720_s26, 4  ;;  %s3721_s23 = smov [#allocation10]   ;;  %s65_s10 = int_to_ptr.vmem [resolvable:$true] %s64_s10 }
  0x7e   :  { %s89_s27 = sshll.u32 %s3721_s23, 4  ;;  %s3566_s1 = scalar_lea.hbm %s4425_s4, 256  ;;  %s90_s27 = int_to_ptr.vmem [resolvable:$true] %s89_s27 }
  0x7f   :  { %p3567_p6 = scmp.ne.s32.totalorder %s4425_s4, %s3566_s1  ;;  %p3570_p7 = scmp.lt.u32.totalorder %s3566_s1, %s4425_s4 }
  0x81   :  { %p3572_p8 = pnand %p3570_p7, %p3567_p6 }
  0x83   :  { %3575 = shalt.err (!%p3572_p8)
}
  0x84   :  { %s3576_s0 = scalar_lea.vmem %s65_s10, 256  ;;  %p3581_p10 = scmp.lt.s32.totalorder %s65_s10, %s65_s10 }
  0x85   :  { %p3577_p9 = scmp.ne.s32.totalorder %s65_s10, %s3576_s0  ;;  %p3582_p11 = scmp.lt.s32.totalorder %s3576_s0, %s3576_s0 }
  0x87   :  { %p3583_p12 = por %p3582_p11, %p3581_p10 }
  0x89   :  { %p3584_p13 = pnand %p3583_p12, %p3577_p9 }
  0x8b   :  { %3587 = shalt.err (!%p3584_p13)
}
  0x8c   :  { %70 = dma.hbm_to_vmem [thread:$0]  %s4425_s4, 256, %s65_s10, [#allocation6], %s4453_s12, %s4453_s12, %s3715_s29  }
  0x8d   :  { %s3588_s3 = scalar_lea.hbm %s4428_s7, 16 }
  0x8e   :  { %p3589_p0 = scmp.ne.s32.totalorder %s4428_s7, %s3588_s3  ;;  %p3592_p1 = scmp.lt.u32.totalorder %s3588_s3, %s4428_s7 }
  0x90   :  { %p3594_p2 = pnand %p3592_p1, %p3589_p0 }
  0x92   :  { %3597 = shalt.err (!%p3594_p2)
}
  0x93   :  { %s3598_s1 = scalar_lea.vmem %s90_s27, 16  ;;  %s3602_s2 = scalar_lea.vmem %s90_s27, 32 }
  0x94   :  { %p3599_p3 = scmp.ne.s32.totalorder %s90_s27, %s3598_s1  ;;  %p3603_p4 = scmp.lt.s32.totalorder %s90_s27, %s90_s27 }
  0x95   :  { %p3604_p5 = scmp.lt.s32.totalorder %s3602_s2, %s3598_s1 }
  0x97   :  { %p3605_p6 = por %p3604_p5, %p3603_p4 }
  0x99   :  { %p3606_p7 = pnand %p3605_p6, %p3599_p3 }
  0x9b   :  { %3609 = shalt.err (!%p3606_p7)
}
  0x9c   :  { %92 = dma.hbm_to_vmem [thread:$0]  %s4428_s7, 16, %s90_s27, [#allocation9]  }
  0x9d   :  { %s3722_s20 = smov [#allocation13]   ;;  %s3723_s24 = smov [#allocation16]  }
  0x9e   :  { %s108_s22 = sshll.u32 %s3722_s20, 4  ;;  %s131_s0 = sshll.u32 %s3723_s24, 4  ;;  %s109_s22 = int_to_ptr.vmem [resolvable:$true] %s108_s22  ;;  %s132_s0 = int_to_ptr.vmem [resolvable:$true] %s131_s0 }
  0x9f   :  { %s3610_s25 = scalar_lea.hbm %s4430_s9, 3072 }
  0xa0   :  { %p3611_p8 = scmp.ne.s32.totalorder %s4430_s9, %s3610_s25  ;;  %p3614_p9 = scmp.lt.u32.totalorder %s3610_s25, %s4430_s9 }
  0xa2   :  { %p3616_p10 = pnand %p3614_p9, %p3611_p8 }
  0xa4   :  { %3619 = shalt.err (!%p3616_p10)
}
  0xa5   :  { %s3620_s7 = scalar_lea.vmem %s109_s22, 3072  ;;  %p3625_p12 = scmp.lt.s32.totalorder %s109_s22, %s109_s22 }
  0xa6   :  { %p3621_p11 = scmp.ne.s32.totalorder %s109_s22, %s3620_s7  ;;  %p3626_p13 = scmp.lt.s32.totalorder %s3620_s7, %s3620_s7 }
  0xa8   :  { %p3627_p0 = por %p3626_p13, %p3625_p12 }
  0xaa   :  { %p3628_p1 = pnand %p3627_p0, %p3621_p11 }
  0xac   :  { %3631 = shalt.err (!%p3628_p1)
}
  0xad   :  { %114 = dma.hbm_to_vmem [thread:$0]  %s4430_s9, 3072, %s109_s22, [#allocation12], %s4453_s12, %s4453_s12, %s3715_s29  }
  0xae   :  { %s3632_s2 = scalar_lea.hbm %s4432_s11, 16 }
  0xaf   :  { %p3633_p2 = scmp.ne.s32.totalorder %s4432_s11, %s3632_s2  ;;  %p3636_p3 = scmp.lt.u32.totalorder %s3632_s2, %s4432_s11 }
  0xb1   :  { %p3638_p4 = pnand %p3636_p3, %p3633_p2 }
  0xb3   :  { %3641 = shalt.err (!%p3638_p4)
}
  0xb4   :  { %s3642_s6 = scalar_lea.vmem %s132_s0, 16  ;;  %s3646_s28 = scalar_lea.vmem %s132_s0, 32 }
  0xb5   :  { %p3643_p5 = scmp.ne.s32.totalorder %s132_s0, %s3642_s6  ;;  %p3647_p6 = scmp.lt.s32.totalorder %s132_s0, %s132_s0 }
  0xb6   :  { %p3648_p7 = scmp.lt.s32.totalorder %s3646_s28, %s3642_s6 }
  0xb8   :  { %p3649_p8 = por %p3648_p7, %p3647_p6 }
  0xba   :  { %p3650_p9 = pnand %p3649_p8, %p3643_p5 }
  0xbc   :  { %3653 = shalt.err (!%p3650_p9)
}
  0xbd   :  { %134 = dma.hbm_to_vmem [thread:$0]  %s4432_s11, 16, %s132_s0, [#allocation15]  }
  0xbe   :  { %s3724_s12 = smov [#allocation19]   ;;  %s3654_s3 = scalar_lea.hbm %s4435_s14, 2048 }
  0xbf   :  { %s152_s22 = sshll.u32 %s3724_s12, 4  ;;  %p3655_p10 = scmp.ne.s32.totalorder %s4435_s14, %s3654_s3  ;;  %s153_s22 = int_to_ptr.vmem [resolvable:$true] %s152_s22 }
  0xc0   :  { %p3658_p11 = scmp.lt.u32.totalorder %s3654_s3, %s4435_s14 }
  0xc2   :  { %p3660_p12 = pnand %p3658_p11, %p3655_p10 }
  0xc4   :  { %3663 = shalt.err (!%p3660_p12)
}
  0xc5   :  { %s3664_s30 = scalar_lea.vmem %s153_s22, 2048  ;;  %p3669_p0 = scmp.lt.s32.totalorder %s153_s22, %s153_s22 }
  0xc6   :  { %p3665_p13 = scmp.ne.s32.totalorder %s153_s22, %s3664_s30  ;;  %p3670_p1 = scmp.lt.s32.totalorder %s3664_s30, %s3664_s30 }
  0xc8   :  { %p3671_p2 = por %p3670_p1, %p3669_p0 }
  0xca   :  { %p3672_p3 = pnand %p3671_p2, %p3665_p13 }
  0xcc   :  { %3675 = shalt.err (!%p3672_p3)
}
  0xcd   :  { %s3725_s11 = smov 256   ;;  %s3726_s0 = smov 16  }
  0xce   :  { %158 = dma.hbm_to_vmem [thread:$0]  %s4435_s14, 2048, %s153_s22, [#allocation18], %s3725_s11, %s3725_s11, %s3726_s0  }
  0xcf   :  { %s3727_s2 = smov [#allocation20]   ;;  %s3676_s24 = scalar_lea.hbm %s4436_s15, 32 }
  0xd0   :  { %s165_s4 = sshll.u32 %s3727_s2, 4  ;;  %p3677_p4 = scmp.ne.s32.totalorder %s4436_s15, %s3676_s24  ;;  %s166_s4 = int_to_ptr.vmem [resolvable:$true] %s165_s4 }
  0xd1   :  { %p3680_p5 = scmp.lt.u32.totalorder %s3676_s24, %s4436_s15 }
  0xd3   :  { %p3682_p6 = pnand %p3680_p5, %p3677_p4 }
  0xd5   :  { %3685 = shalt.err (!%p3682_p6)
}
  0xd6   :  { %s3686_s12 = scalar_lea.vmem %s166_s4, 32  ;;  %p3691_p8 = scmp.lt.s32.totalorder %s166_s4, %s166_s4 }
  0xd7   :  { %p3687_p7 = scmp.ne.s32.totalorder %s166_s4, %s3686_s12  ;;  %p3692_p9 = scmp.lt.s32.totalorder %s3686_s12, %s3686_s12 }
  0xd9   :  { %p3693_p10 = por %p3692_p9, %p3691_p8 }
  0xdb   :  { %p3694_p11 = pnand %p3693_p10, %p3687_p7 }
  0xdd   :  { %3697 = shalt.err (!%p3694_p11)
}
  0xde   :  { %168 = dma.hbm_to_vmem [thread:$0]  %s4436_s15, 32, %s166_s4, [#allocation21]  }
  0xdf   :  { %3698 = dma.done.wait [#allocation4], 512  }
  0xe0   :  { %3699 = vsyncadd [#allocation4], 4294966784 }
  0xe1   :  { %3700 = dma.done.wait [#allocation6], 512  }
  0xe2   :  { %3701 = vsyncadd [#allocation6], 4294966784 }
  0xe3   :  { %3702 = dma.done.wait [#allocation9], 32  }
  0xe4   :  { %3703 = vsyncadd [#allocation9], 4294967264 }
  0xe5   :  { %3704 = dma.done.wait [#allocation12], 3088  }
  0xe6   :  { %3705 = vsyncadd [#allocation12], 4294964208 }
  0xe7   :  { %3706 = dma.done.wait [#allocation15], 32  }
  0xe8   :  { %3707 = vsyncadd [#allocation15], 4294967264 }
  0xe9   :  { %3708 = dma.done.wait [#allocation18], 2064  }
  0xea   :  { %3709 = vsyncadd [#allocation18], 4294965232 }
  0xeb   :  { %3710 = dma.done.wait [#allocation21], 32  }
  0xec   :  { %3711 = vsyncadd [#allocation21], 4294967264  ;;  %vm247_vm0 = vcmask 1045504   ;;  %vm234_vm1 = vcmask 48128   ;;  %v336_v0 = vld [vmem:[%s4426_s5] sm:$0x3f] }
  0xed   :  { %s4454_s26 = sld [smem:[#allocation29_spill]]  ;;  %2950 = vmatprep.subr.msk.mxu1 %vm247_vm0, %v336_v0  ;;  %v2805_v4 = vld [vmem:[%s4426_s5 + $0x10] sm:$0x3f]  ;;  %v2789_v6 = vld [vmem:[%s4426_s5 + $0x8] sm:$0x3f]  ;;  %s4455_s24 = sld [smem:[#allocation30_spill]] }
  0xee   :  { %2951 = vmatpush3.msk.msra.mxu1 %vm247_vm0, %v336_v0  ;;  %2942 = vmatprep.subr.msk.mxu0 %vm247_vm0, %v2789_v6  ;;  %vm425_vm2 = vcmask 261120   ;;  %v219_v23 = vld [vmem:[#allocation3] sm:$0xff]  ;;  %v220_v24 = vld [vmem:[#allocation3 + $0x8] sm:$0xff]  ;;  %v221_v25 = vld [vmem:[#allocation3 + $0x10] sm:$0xff]  ;;  %vm718_vm3 = vcmask 523264   ;;  %vm873_vm4 = vcmask 517120  }
  0xef   :  { %2972 = vmatprep.subr.msk.mxu1 %vm247_vm0, %v2805_v4  ;;  %2943 = vmatpush3.msk.msra.mxu0 %vm247_vm0, %v2789_v6  ;;  %v222_v26 = vld [vmem:[#allocation3 + $0x18] sm:$0xff]  ;;  %v994_v27 = vld [vmem:[#allocation13 + $0x40] sm:$0xff]  ;;  %v995_v28 = vld [vmem:[#allocation13 + $0x48] sm:$0xff]  ;;  %vm1024_vm5 = vcmask 1041409   ;;  %vm1026_vm6 = vcmask 1042434   ;;  %vm1028_vm7 = vcmask 1043459  }
  0xf0   :  { %v1124_v29 = vld [vmem:[#allocation13] sm:$0xff]  ;;  %v3129_v30 = vpack.c.bf16 %v995_v28, %v994_v27  ;;  %v1125_v31 = vld [vmem:[#allocation13 + $0x8] sm:$0xff]  ;;  %v996_v33 = vld [vmem:[#allocation13 + $0x50] sm:$0xff]  ;;  %vm1030_vm8 = vcmask 1044484   ;;  %vm1032_vm9 = vcmask 1045509   ;;  %vm1034_vm10 = vcmask 1046534  }
  0xf1   :  { %v3145_v32 = vpack.c.bf16 %v1125_v31, %v1124_v29  ;;  %v997_v34 = vld [vmem:[#allocation13 + $0x58] sm:$0xff]  ;;  %v1126_v35 = vld [vmem:[#allocation13 + $0x10] sm:$0xff]  ;;  %v998_v38 = vld [vmem:[#allocation13 + $0x60] sm:$0xff]  ;;  %vm1036_vm11 = vcmask 1047559   ;;  %vm1207_vm12 = vcmask 130048   ;;  %vm2069_vm13 = vcmask 518145  }
  0xf2   :  { %v3133_v36 = vpack.c.bf16 %v997_v34, %v996_v33  ;;  %v1127_v37 = vld [vmem:[#allocation13 + $0x18] sm:$0xff]  ;;  %v999_v39 = vld [vmem:[#allocation13 + $0x68] sm:$0xff]  ;;  %v1128_v42 = vld [vmem:[#allocation13 + $0x20] sm:$0xff]  ;;  %v3728_v33 = vmov 1983009808   ;;  %vm2239_vm14 = vcmask 519170  }
  0xf3   :  { %v211_v1 = vld [vmem:[%s4454_s26] sm:$0xff]  ;;  %v212_v2 = vld [vmem:[%s4454_s26 + $0x8] sm:$0xff]  ;;  %v213_v3 = vld [vmem:[%s4454_s26 + $0x10] sm:$0xff]  ;;  %v3149_v40 = vpack.c.bf16 %v1127_v37, %v1126_v35  ;;  %v3137_v41 = vpack.c.bf16 %v999_v39, %v998_v38  ;;  %v791_v34 = vunpack.c.l.s4 %v3728_v33  ;;  %v793_v35 = vlaneseq }
  0xf4   :  { %2952 = vmatprep.mubr.msk.f32.mxu1 %vm234_vm1, %v211_v1  ;;  %2944 = vmatprep.mubr.msk.f32.mxu0 %vm234_vm1, %v211_v1  ;;  %v214_v5 = vld [vmem:[%s4454_s26 + $0x18] sm:$0xff]  ;;  %v215_v7 = vld [vmem:[%s4455_s24] sm:$0xff]  ;;  %v216_v16 = vld [vmem:[%s4455_s24 + $0x8] sm:$0xff]  ;;  %vm2436_vm15 = vcmask 31744  }
  0xf5   :  { %2953 = vmatmul.mubr.msk.f32.vlgmr.msra.gmra.mrb[0].mxu1 %vm234_vm1, %v212_v2  ;;  %2945 = vmatmul.mubr.msk.f32.vlgmr.msra.gmra.mrb[0].mxu0 %vm234_vm1, %v212_v2  ;;  %v217_v18 = vld [vmem:[%s4455_s24 + $0x10] sm:$0xff]  ;;  %v218_v21 = vld [vmem:[%s4455_s24 + $0x18] sm:$0xff]  ;;  %v1001_v46 = vld [vmem:[#allocation13 + $0x78] sm:$0xff]  ;;  %v792_v38 = vunpack.c.0.s8 %v791_v34  ;;  %v4069_v39 = vshrl.u32 %v793_v35, 7 }
  0xf6   :  { %2955 = vmatprep.mubr.msk.f32.mxu1 %vm234_vm1, %v213_v3  ;;  %2973 = vmatpush3.msk.msra.mxu1 %vm247_vm0, %v2805_v4  ;;  %v1129_v43 = vld [vmem:[#allocation13 + $0x28] sm:$0xff]  ;;  %v1000_v44 = vld [vmem:[#allocation13 + $0x70] sm:$0xff]  ;;  %v1131_v48 = vld [vmem:[#allocation13 + $0x38] sm:$0xff]  ;;  %vm2409_vm0 = vcmask 520195  }
  0xf7   :  { %2947 = vmatprep.mubr.msk.f32.mxu0 %vm234_vm1, %v213_v3  ;;  %3130 = vmatprep.subr.bf16.mxu1 %v3129_v30  ;;  %v3153_v45 = vpack.c.bf16 %v1129_v43, %v1128_v42  ;;  %v1130_v47 = vld [vmem:[#allocation13 + $0x30] sm:$0xff]  ;;  %v3141_v49 = vpack.c.bf16 %v1001_v46, %v1000_v44  ;;  %v2790_v51 = vld [vmem:[#allocation8] ss:$0 sm:$0xff]  ;;  %v2815_v37 = vld [vmem:[#allocation10] ss:$0 sm:$0xff] }
  0xf8   :  { %v3157_v50 = vpack.c.bf16 %v1131_v48, %v1130_v47  ;;  %v2816_v44 = vld [vmem:[#allocation11] ss:$0 sm:$0xff] }
  0xf9   :  { %2956 = vmatmul.mubr.msk.f32.gmra.mrb[2].mxu1 %vm234_vm1, %v214_v5  ;;  %2948 = vmatmul.mubr.msk.f32.gmra.mrb[2].mxu0 %vm234_vm1, %v214_v5 }
  0xfa   :  { %2974 = vmatprep.mubr.msk.f32.mxu1 %vm234_vm1, %v211_v1  ;;  %2966 = vmatprep.mubr.msk.f32.mxu0 %vm425_vm2, %v215_v7 }
  0xfd   :  { %2975 = vmatmul.mubr.msk.f32.vlgmr.msra.gmra.mrb[4].mxu1 %vm234_vm1, %v212_v2 }
  0xfe   :  { %2977 = vmatprep.mubr.msk.f32.mxu1 %vm234_vm1, %v213_v3  ;;  %3132 = vmatpush3.bf16.msra.mxu1 %v3129_v30 }
  0xff   :  { %3134 = vmatprep.subr.bf16.mxu1 %v3133_v36 }
 0x101   :  { %2978 = vmatmul.mubr.msk.f32.gmra.mrb[6].mxu1 %vm234_vm1, %v214_v5  ;;  %vm2443_vm1 = vcmask 1043456  }
 0x102   :  { %3136 = vmatpush3.bf16.msra.mxu1 %v3133_v36 }
 0x103   :  { %3138 = vmatprep.subr.bf16.mxu1 %v3137_v41 }
 0x106   :  { %3140 = vmatpush3.bf16.msra.mxu1 %v3137_v41 }
 0x107   :  { %3142 = vmatprep.subr.bf16.mxu1 %v3141_v49 }
 0x10a   :  { %3144 = vmatpush3.bf16.msra.mxu1 %v3141_v49  ;;  %v4072_v49 = vsub.s32 %v792_v38, %v4069_v39 }
 0x1c8   :  { %v2954_v8 = vpop.f32.mrb[0].mxu1 }
 0x1c9   :  { %v406_v9 = vpop.f32.mrb[1].mxu1 }
 0x1ca   :  { %v3113_v10 = vpack.c.bf16 %v2954_v8, %v406_v9 }
 0x1cc   :  { %v2957_v11 = vpop.f32.mrb[2].mxu1  ;;  %3114 = vmatprep.subr.bf16.mxu0 %v3113_v10 }
 0x1cd   :  { %v416_v12 = vpop.f32.mrb[3].mxu1  ;;  %3116 = vmatpush3.bf16.msra.mxu0 %v3113_v10 }
 0x1ce   :  { %v3117_v13 = vpack.c.bf16 %v2957_v11, %v416_v12 }
 0x1d0   :  { %3118 = vmatprep.subr.bf16.mxu0 %v3117_v13  ;;  %v2976_v14 = vpop.f32.mrb[4].mxu1 }
 0x1d1   :  { %3120 = vmatpush3.bf16.msra.mxu0 %v3117_v13  ;;  %v598_v15 = vpop.f32.mrb[5].mxu1 }
 0x1d2   :  { %v3121_v17 = vpack.c.bf16 %v2976_v14, %v598_v15 }
 0x1d4   :  { %2967 = vmatmul.mubr.msk.f32.vlgmr.msra.gmra.mrb[0].mxu0 %vm425_vm2, %v216_v16  ;;  %v2979_v19 = vpop.f32.mrb[6].mxu1  ;;  %3122 = vmatprep.subr.bf16.mxu0 %v3121_v17 }
 0x1d5   :  { %v608_v20 = vpop.f32.mrb[7].mxu1  ;;  %3124 = vmatpush3.bf16.msra.mxu0 %v3121_v17  ;;  %2969 = vmatprep.mubr.msk.f32.mxu0 %vm425_vm2, %v217_v18 }
 0x1d6   :  { %v3125_v22 = vpack.c.bf16 %v2979_v19, %v608_v20 }
 0x1d8   :  { %2970 = vmatmul.mubr.msk.f32.gmra.mrb[2].mxu0 %vm425_vm2, %v218_v21  ;;  %3126 = vmatprep.subr.bf16.mxu0 %v3125_v22 }
 0x1d9   :  { %3128 = vmatpush3.bf16.msra.mxu0 %v3125_v22  ;;  %2988 = vmatprep.mubr.msk.f32.mxu0 %vm425_vm2, %v219_v23 }
 0x1da   :  { %3146 = vmatprep.subr.bf16.mxu0 %v3145_v32 }
 0x1dc   :  { %2989 = vmatmul.mubr.msk.f32.vlgmr.msra.gmra.mrb[0].mxu0 %vm425_vm2, %v220_v24 }
 0x1dd   :  { %2991 = vmatprep.mubr.msk.f32.mxu0 %vm425_vm2, %v221_v25  ;;  %3148 = vmatpush3.bf16.msra.mxu0 %v3145_v32 }
 0x1de   :  { %3150 = vmatprep.subr.bf16.mxu0 %v3149_v40 }
 0x1e0   :  { %2992 = vmatmul.mubr.msk.f32.gmra.mrb[2].mxu0 %vm425_vm2, %v222_v26  ;;  %vm2608_vm2 = vcmask 39936  }
 0x1e1   :  { %3152 = vmatpush3.bf16.msra.mxu0 %v3149_v40 }
 0x1e2   :  { %3154 = vmatprep.subr.bf16.mxu0 %v3153_v45 }
 0x1e5   :  { %3156 = vmatpush3.bf16.msra.mxu0 %v3153_v45 }
 0x1e6   :  { %3158 = vmatprep.subr.bf16.mxu0 %v3157_v50 }
 0x1e9   :  { %3160 = vmatpush3.bf16.msra.mxu0 %v3157_v50 }
 0x2af   :  { %v2990_v52 = vpop.f32.mrb[0].mxu0 }
 0x2b0   :  { %v3297_v53 = vadd.f32 %v2990_v52, %v2790_v51  ;;  %v695_v54 = vpop.f32.mrb[1].mxu0 }
 0x2b1   :  { %v3298_v55 = vadd.f32 %v2790_v51, %v695_v54 }
 0x2b2   :  { %v720_v56 = vsel %vm718_vm3, %v3297_v53, 0.0 }
 0x2b3   :  { %v719_v57 = vsel %vm718_vm3, %v3298_v55, 0.0  ;;  %v2993_v58 = vpop.f32.mrb[2].mxu0 }
 0x2b4   :  { %v721_v59 = vadd.f32 %v720_v56, %v719_v57  ;;  %v705_v60 = vpop.f32.mrb[3].mxu0  ;;  %v3299_v61 = vadd.f32 %v2993_v58, %v2790_v51 }
 0x2b5   :  { %v3300_v62 = vadd.f32 %v2790_v51, %v705_v60 }
 0x2b6   :  { %v724_v1 = vsel %vm718_vm3, %v3299_v61, 0.0 }
 0x2b7   :  { %v722_v63 = vsel %vm718_vm3, %v3300_v62, 0.0 }
 0x2b8   :  { %v723_v0 = vadd.f32 %v722_v63, %v721_v59 }
 0x2ba   :  { %v725_v2 = vadd.f32 %v724_v1, %v723_v0 }
 0x2bc   :  { %v726_v3 = vrot.slane %v725_v2, 4 }
 0x2be   :  { %v727_v4 = vadd.f32 %v726_v3, %v725_v2 }
 0x2c0   :  { %v728_v5 = vrot.slane %v727_v4, 2 }
 0x2c2   :  { %v729_v6 = vadd.f32 %v728_v5, %v727_v4 }
 0x2c4   :  { %v730_v7 = vrot.slane %v729_v6, 1 }
 0x2c6   :  { %v731_v8 = vadd.f32 %v730_v7, %v729_v6 }
 0x2c8   :  { %v732_v9 = vmul.f32 0.03125, %v731_v8 }
 0x2ca   :  { %v733_v10 = vsub.f32 %v3298_v55, %v732_v9  ;;  %v734_v11 = vsub.f32 %v3297_v53, %v732_v9  ;;  %v735_v12 = vsub.f32 %v3300_v62, %v732_v9  ;;  %v736_v13 = vsub.f32 %v3299_v61, %v732_v9 }
 0x2cc   :  { %v737_v14 = vmul.f32 %v733_v10, %v733_v10  ;;  %v738_v15 = vmul.f32 %v734_v11, %v734_v11  ;;  %v739_v16 = vmul.f32 %v735_v12, %v735_v12  ;;  %v740_v17 = vmul.f32 %v736_v13, %v736_v13 }
 0x2ce   :  { %v741_v18 = vsel %vm718_vm3, %v737_v14, 0.0  ;;  %v742_v19 = vsel %vm718_vm3, %v738_v15, 0.0  ;;  %v744_v21 = vsel %vm718_vm3, %v739_v16, 0.0  ;;  %v746_v23 = vsel %vm718_vm3, %v740_v17, 0.0 }
 0x2cf   :  { %v743_v20 = vadd.f32 %v742_v19, %v741_v18 }
 0x2d1   :  { %v745_v22 = vadd.f32 %v744_v21, %v743_v20 }
 0x2d3   :  { %v747_v24 = vadd.f32 %v746_v23, %v745_v22 }
 0x2d5   :  { %v748_v25 = vrot.slane %v747_v24, 4 }
 0x2d7   :  { %v749_v26 = vadd.f32 %v748_v25, %v747_v24 }
 0x2d9   :  { %v750_v27 = vrot.slane %v749_v26, 2 }
 0x2db   :  { %v751_v28 = vadd.f32 %v750_v27, %v749_v26 }
 0x2dd   :  { %v752_v29 = vrot.slane %v751_v28, 1 }
 0x2df   :  { %v753_v30 = vadd.f32 %v752_v29, %v751_v28 }
 0x2e1   :  { %v754_v31 = vmul.f32 0.03125, %v753_v30 }
 0x2e3   :  { %v755_v32 = vadd.f32 1e-05, %v754_v31 }
 0x2e5   :  { %3334 = vrsqrt.f32 %v755_v32 }
 0x2ef   :  { %v3335_v36 = vpop.eup %3334 }
 0x2f0   :  { %v757_v40 = vmul.f32 %v3335_v36, %v733_v10  ;;  %v758_v41 = vmul.f32 %v3335_v36, %v734_v11  ;;  %v759_v42 = vmul.f32 %v3335_v36, %v735_v12  ;;  %v760_v43 = vmul.f32 %v3335_v36, %v736_v13 }
 0x2f2   :  { %v767_v45 = vmul.f32 %v2815_v37, %v757_v40  ;;  %v768_v46 = vmul.f32 %v2815_v37, %v758_v41  ;;  %v769_v47 = vmul.f32 %v2815_v37, %v759_v42  ;;  %v770_v48 = vmul.f32 %v2815_v37, %v760_v43 }
 0x2f4   :  { %v777_v50 = vadd.f32 %v2816_v44, %v767_v45  ;;  %v778_v51 = vadd.f32 %v2816_v44, %v768_v46  ;;  %v779_v52 = vadd.f32 %v2816_v44, %v769_v47  ;;  %v780_v53 = vadd.f32 %v2816_v44, %v770_v48 }
 0x2f6   :  { %v781_v54 = vmax.f32 %v777_v50, 0.0  ;;  %v782_v55 = vmax.f32 %v778_v51, 0.0  ;;  %v783_v56 = vmax.f32 %v779_v52, 0.0  ;;  %v784_v57 = vmax.f32 %v780_v53, 0.0 }
 0x2f8   :  { %v789_v58 = vcombine.high %v781_v54, %v781_v54  ;;  %v796_v59 = vrot.slane %v781_v54, %v4072_v49  ;;  %v823_v60 = vcombine.high %v783_v56, %v783_v56  ;;  %v4076_v61 = vrot.slane %v782_v55, %v4072_v49 }
 0x2f9   :  { %v830_v62 = vrot.slane %v783_v56, %v4072_v49  ;;  %v840_v63 = vcombine.high %v784_v57, %v784_v57  ;;  %v4080_v0 = vrot.slane %v784_v57, %v4072_v49  ;;  %v806_v8 = vcombine.high %v782_v55, %v782_v55 }
 0x2fa   :  { %v803_v1 = vrot.slane %v789_v58, %v4072_v49  ;;  %v804_v2 = vcombine.high %v796_v59, %v796_v59  ;;  %v837_v3 = vrot.slane %v823_v60, %v4072_v49  ;;  %v874_v4 = vsel %vm873_vm4, %v796_v59, -inf }
 0x2fb   :  { %v838_v5 = vcombine.high %v830_v62, %v830_v62  ;;  %v4086_v6 = vrot.slane %v840_v63, %v4072_v49  ;;  %v875_v7 = vrot.slane %v874_v4, 4  ;;  %v855_v10 = vcombine.high %v4080_v0, %v4080_v0 }
 0x2fc   :  { %v839_v9 = vcombine.high %v837_v3, %v837_v3  ;;  %v881_v11 = vsel %vm873_vm4, %v804_v2, -inf  ;;  %v888_v12 = vsel %vm873_vm4, %v803_v1, -inf  ;;  %v930_v16 = vsel %vm873_vm4, %v830_v62, -inf }
 0x2fd   :  { %v876_v13 = vmax.f32 %v874_v4, %v875_v7  ;;  %v882_v14 = vrot.slane %v881_v11, 4  ;;  %v889_v15 = vrot.slane %v888_v12, 4  ;;  %v931_v17 = vrot.slane %v930_v16, 4 }
 0x2fe   :  { %v937_v18 = vsel %vm873_vm4, %v838_v5, -inf  ;;  %v944_v19 = vsel %vm873_vm4, %v837_v3, -inf  ;;  %v951_v20 = vsel %vm873_vm4, %v839_v9, -inf  ;;  %v958_v27 = vsel %vm873_vm4, %v4080_v0, -inf }
 0x2ff   :  { %v877_v21 = vrot.slane %v876_v13, 2  ;;  %v883_v22 = vmax.f32 %v881_v11, %v882_v14  ;;  %v938_v23 = vrot.slane %v937_v18, 4  ;;  %v945_v24 = vrot.slane %v944_v19, 4 }
 0x300   :  { %v932_v25 = vmax.f32 %v930_v16, %v931_v17  ;;  %v952_v26 = vrot.slane %v951_v20, 4  ;;  %v820_v28 = vrot.slane %v806_v8, %v4072_v49  ;;  %v805_v29 = vcombine.high %v803_v1, %v803_v1 }
 0x301   :  { %v939_v30 = vmax.f32 %v937_v18, %v938_v23  ;;  %v946_v31 = vmax.f32 %v944_v19, %v945_v24  ;;  %v959_v32 = vrot.slane %v958_v27, 4  ;;  %v821_v35 = vcombine.high %v4076_v61, %v4076_v61 }
 0x302   :  { %v933_v33 = vrot.slane %v932_v25, 2  ;;  %v953_v34 = vmax.f32 %v951_v20, %v952_v26  ;;  %v822_v36 = vcombine.high %v820_v28, %v820_v28  ;;  %v856_v40 = vcombine.high %v4086_v6, %v4086_v6 }
 0x303   :  { %v940_v37 = vrot.slane %v939_v30, 2  ;;  %v947_v38 = vrot.slane %v946_v31, 2  ;;  %v878_v41 = vmax.f32 %v876_v13, %v877_v21  ;;  %v884_v44 = vrot.slane %v883_v22, 2 }
 0x304   :  { %v934_v42 = vmax.f32 %v932_v25, %v933_v33  ;;  %v954_v43 = vrot.slane %v953_v34, 2  ;;  %v890_v45 = vmax.f32 %v888_v12, %v889_v15  ;;  %v895_v50 = vsel %vm873_vm4, %v805_v29, -inf }
 0x305   :  { %v941_v46 = vmax.f32 %v939_v30, %v940_v37  ;;  %v948_v47 = vmax.f32 %v946_v31, %v947_v38  ;;  %v879_v48 = vrot.slane %v878_v41, 1  ;;  %v885_v53 = vmax.f32 %v883_v22, %v884_v44 }
 0x306   :  { %v935_v51 = vrot.slane %v934_v42, 1  ;;  %v955_v52 = vmax.f32 %v953_v34, %v954_v43  ;;  %v891_v54 = vrot.slane %v890_v45, 2  ;;  %v960_v57 = vmax.f32 %v958_v27, %v959_v32 }
 0x307   :  { %v942_v55 = vrot.slane %v941_v46, 1  ;;  %v949_v56 = vrot.slane %v948_v47, 1  ;;  %v896_v58 = vrot.slane %v895_v50, 4  ;;  %v880_v60 = vmax.f32 %v878_v41, %v879_v48 }
 0x308   :  { %v4104_v59 = vmax.f32 %v934_v42, %v935_v51  ;;  %v886_v62 = vrot.slane %v885_v53, 1  ;;  %v892_v63 = vmax.f32 %v890_v45, %v891_v54  ;;  %v956_v2 = vrot.slane %v955_v52, 1 }
 0x309   :  { %v4106_v1 = vmax.f32 %v941_v46, %v942_v55  ;;  %v897_v3 = vmax.f32 %v895_v50, %v896_v58  ;;  %v902_v4 = vsel %vm873_vm4, %v4076_v61, -inf  ;;  %v4110_v5 = vmax.f32 %v948_v47, %v949_v56 }
 0x30a   :  { %v893_v7 = vrot.slane %v892_v63, 1  ;;  %v903_v8 = vrot.slane %v902_v4, 4  ;;  %v909_v9 = vsel %vm873_vm4, %v821_v35, -inf  ;;  %v916_v13 = vsel %vm873_vm4, %v820_v28, -inf }
 0x30b   :  { %v898_v11 = vrot.slane %v897_v3, 2  ;;  %v910_v12 = vrot.slane %v909_v9, 4  ;;  %v923_v14 = vsel %vm873_vm4, %v822_v36, -inf  ;;  %v887_v15 = vmax.f32 %v885_v53, %v886_v62 }
 0x30c   :  { %v904_v16 = vmax.f32 %v902_v4, %v903_v8  ;;  %v917_v17 = vrot.slane %v916_v13, 4  ;;  %v924_v18 = vrot.slane %v923_v14, 4  ;;  %v894_v61 = vmax.f32 %v892_v63, %v893_v7 }
 0x30d   :  { %v899_v19 = vmax.f32 %v897_v3, %v898_v11  ;;  %v911_v20 = vmax.f32 %v909_v9, %v910_v12  ;;  %v961_v21 = vrot.slane %v960_v57, 2  ;;  %v965_v25 = vsel %vm873_vm4, %v855_v10, -inf }
 0x30e   :  { %v905_v22 = vrot.slane %v904_v16, 2  ;;  %v918_v23 = vmax.f32 %v916_v13, %v917_v17  ;;  %v925_v24 = vmax.f32 %v923_v14, %v924_v18  ;;  %v966_v29 = vrot.slane %v965_v25, 4 }
 0x30f   :  { %v900_v26 = vrot.slane %v899_v19, 1  ;;  %v912_v27 = vrot.slane %v911_v20, 2  ;;  %v962_v28 = vmax.f32 %v960_v57, %v961_v21  ;;  %v972_v33 = vsel %vm873_vm4, %v4086_v6, -inf  ;;  %v1293_v21 = vld [vmem:[#allocation13 + $0x88] sm:$0xff] }
 0x310   :  { %v906_v30 = vmax.f32 %v904_v16, %v905_v22  ;;  %v919_v31 = vrot.slane %v918_v23, 2  ;;  %v926_v32 = vrot.slane %v925_v24, 2  ;;  %v957_v35 = vmax.f32 %v955_v52, %v956_v2 }
 0x311   :  { %v913_v34 = vmax.f32 %v911_v20, %v912_v27  ;;  %v963_v36 = vrot.slane %v962_v28, 1  ;;  %v967_v37 = vmax.f32 %v965_v25, %v966_v29  ;;  %v973_v41 = vrot.slane %v972_v33, 4  ;;  %v1292_v20 = vld [vmem:[#allocation13 + $0x80] sm:$0xff]  ;;  %v1295_v27 = vld [vmem:[#allocation13 + $0x98] sm:$0xff] }
 0x312   :  { %v907_v0 = vrot.slane %v906_v30, 1  ;;  %v920_v38 = vmax.f32 %v918_v23, %v919_v31  ;;  %v927_v10 = vmax.f32 %v925_v24, %v926_v32  ;;  %v901_v42 = vmax.f32 %v899_v19, %v900_v26  ;;  %v986_v19 = vld [vmem:[#allocation5] sm:$0xff]  ;;  %v1294_v26 = vld [vmem:[#allocation13 + $0x90] sm:$0xff]  ;;  %v1297_v31 = vld [vmem:[#allocation13 + $0xa8] sm:$0xff] }
 0x313   :  { %v914_v43 = vrot.slane %v913_v34, 1  ;;  %v968_v44 = vrot.slane %v967_v37, 2  ;;  %v979_v45 = vsel %vm873_vm4, %v856_v40, -inf  ;;  %v964_v48 = vmax.f32 %v962_v28, %v963_v36  ;;  %v987_v28 = vld [vmem:[#allocation5 + $0x8] sm:$0xff]  ;;  %v988_v36 = vld [vmem:[#allocation7] sm:$0xff] }
 0x314   :  { %v921_v46 = vrot.slane %v920_v38, 1  ;;  %v928_v47 = vrot.slane %v927_v10, 1  ;;  %v974_v50 = vmax.f32 %v972_v33, %v973_v41  ;;  %v908_v51 = vmax.f32 %v906_v30, %v907_v0  ;;  %v1296_v30 = vld [vmem:[#allocation13 + $0xa0] sm:$0xff]  ;;  %v1298_v33 = vld [vmem:[#allocation13 + $0xb0] sm:$0xff] }
 0x315   :  { %v969_v52 = vmax.f32 %v967_v37, %v968_v44  ;;  %v980_v53 = vrot.slane %v979_v45, 4  ;;  %v1025_v54 = vsel %vm1024_vm5, %v887_v15, %v880_v60  ;;  %v915_v55 = vmax.f32 %v913_v34, %v914_v43  ;;  %v1299_v34 = vld [vmem:[#allocation13 + $0xb8] sm:$0xff] }
 0x316   :  { %v922_v56 = vmax.f32 %v920_v38, %v921_v46  ;;  %v975_v57 = vrot.slane %v974_v50, 2  ;;  %v1027_v58 = vsel %vm1026_vm6, %v894_v61, %v1025_v54  ;;  %v1038_v40 = vsel %vm1024_vm5, %v4106_v1, %v4104_v59  ;;  %v1605_v41 = vld [vmem:[%s4434_s13 + $0x8] sm:$0xff]  ;;  %v1604_v44 = vld [vmem:[%s4434_s13] sm:$0xff] }
 0x317   :  { %v970_v62 = vrot.slane %v969_v52, 1  ;;  %v981_v63 = vmax.f32 %v979_v45, %v980_v53  ;;  %v1029_v6 = vsel %vm1028_vm7, %v901_v42, %v1027_v58  ;;  %v929_v2 = vmax.f32 %v927_v10, %v928_v47  ;;  %v989_v10 = vld [vmem:[#allocation7 + $0x8] sm:$0xff]  ;;  %v1607_v42 = vld [vmem:[%s4434_s13 + $0x18] sm:$0xff]  ;;  %v1606_v45 = vld [vmem:[%s4434_s13 + $0x10] sm:$0xff] }
 0x318   :  { %v976_v3 = vmax.f32 %v974_v50, %v975_v57  ;;  %v1031_v4 = vsel %vm1030_vm8, %v908_v51, %v1029_v6  ;;  %v1039_v60 = vsel %vm1026_vm6, %v4110_v5, %v1038_v40  ;;  %v3165_v25 = vpack.c.bf16 %v1293_v21, %v1292_v20  ;;  %v1609_v47 = vld [vmem:[%s4434_s13 + $0x28] sm:$0xff]  ;;  %v1608_v51 = vld [vmem:[%s4434_s13 + $0x20] sm:$0xff]  ;;  %v1614_v58 = vld [vmem:[%s4434_s13 + $0x50] sm:$0xff] }
 0x319   :  { %v971_v7 = vmax.f32 %v969_v52, %v970_v62  ;;  %v982_v8 = vrot.slane %v981_v63, 2  ;;  %v1033_v9 = vsel %vm1032_vm9, %v915_v55, %v1031_v4  ;;  %v1040_v11 = vsel %vm1028_vm7, %v957_v35, %v1039_v60  ;;  %v1610_v52 = vld [vmem:[%s4434_s13 + $0x30] sm:$0xff]  ;;  %v1613_v54 = vld [vmem:[%s4434_s13 + $0x48] sm:$0xff]  ;;  %v1615_v55 = vld [vmem:[%s4434_s13 + $0x58] sm:$0xff] }
 0x31a   :  { %v977_v12 = vrot.slane %v976_v3, 1  ;;  %v1035_v13 = vsel %vm1034_vm10, %v922_v56, %v1033_v9  ;;  %v1041_v14 = vsel %vm1030_vm8, %v964_v48, %v1040_v11  ;;  %v3169_v29 = vpack.c.bf16 %v1295_v27, %v1294_v26  ;;  %v1611_v48 = vld [vmem:[%s4434_s13 + $0x38] sm:$0xff]  ;;  %v1612_v56 = vld [vmem:[%s4434_s13 + $0x40] sm:$0xff]  ;;  %v1617_v62 = vld [vmem:[%s4434_s13 + $0x68] sm:$0xff] }
 0x31b   :  { %v983_v15 = vmax.f32 %v981_v63, %v982_v8  ;;  %v1037_v59 = vsel %vm1036_vm11, %v929_v2, %v1035_v13  ;;  %v1042_v1 = vsel %vm1032_vm9, %v971_v7, %v1041_v14  ;;  %v3173_v32 = vpack.c.bf16 %v1297_v31, %v1296_v30  ;;  %v1619_v63 = vld [vmem:[%s4434_s13 + $0x78] sm:$0xff]  ;;  %v1618_v4 = vld [vmem:[%s4434_s13 + $0x70] sm:$0xff]  ;;  %v1736_v20 = vld [vmem:[#allocation19 + $0x50] sm:$0xff] }
 0x31c   :  { %v978_v16 = vmax.f32 %v976_v3, %v977_v12  ;;  %3010 = vmatprep.mubr.msk.f32.mxu1 %vm718_vm3, %v1037_v59  ;;  %3029 = vmatprep.mubr.msk.f32.mxu0 %vm718_vm3, %v1037_v59  ;;  %v3177_v35 = vpack.c.bf16 %v1299_v34, %v1298_v33  ;;  %v3185_v43 = vpack.c.bf16 %v1607_v42, %v1605_v41  ;;  %v3729_v6 = vmov 0.0   ;;  %v1616_v3 = vld [vmem:[%s4434_s13 + $0x60] sm:$0xff]  ;;  %v1729_v7 = vld [vmem:[#allocation19 + $0x18] sm:$0xff]  ;;  %v1726_v11 = vld [vmem:[#allocation19] sm:$0xff]  ;;  %s3730_s13 = smov 64  }
 0x31d   :  { %v984_v5 = vrot.slane %v983_v15, 1  ;;  %v3187_v46 = vpack.c.bf16 %v1606_v45, %v1604_v44  ;;  %v3189_v50 = vpack.c.bf16 %v1611_v48, %v1609_v47  ;;  %v3191_v53 = vpack.c.bf16 %v1610_v52, %v1608_v51  ;;  %v1727_v60 = vld [vmem:[#allocation19 + $0x8] sm:$0xff]  ;;  %v1728_v12 = vld [vmem:[#allocation19 + $0x10] sm:$0xff] }
 0x31e   :  { %v1043_v17 = vsel %vm1034_vm10, %v978_v16, %v1042_v1  ;;  %3186 = vmatprep.subr.bf16.mxu0 %v3185_v43  ;;  %v3193_v57 = vpack.c.bf16 %v1615_v55, %v1613_v54  ;;  %v3195_v40 = vpack.c.bf16 %v1614_v58, %v1612_v56  ;;  %v3197_v2 = vpack.c.bf16 %v1619_v63, %v1617_v62  ;;  %v1731_v14 = vld [vmem:[#allocation19 + $0x28] sm:$0xff]  ;;  %v1730_v1 = vld [vmem:[#allocation19 + $0x20] sm:$0xff]  ;;  %v1732_v16 = vld [vmem:[#allocation19 + $0x30] sm:$0xff] }
 0x31f   :  { %v985_v18 = vmax.f32 %v983_v15, %v984_v5  ;;  %v4202_v8 = vpack.c.bf16 %v1729_v7, %v1727_v60  ;;  %v3199_v9 = vpack.c.bf16 %v1618_v4, %v1616_v3  ;;  %v4205_v13 = vpack.c.bf16 %v1728_v12, %v1726_v11  ;;  %v1733_v15 = vld [vmem:[#allocation19 + $0x38] sm:$0xff]  ;;  %v1740_v26 = vld [vmem:[#allocation19 + $0x70] sm:$0xff] }
 0x320   :  { %v4212_v5 = vpack.c.bf16 %v1732_v16, %v1730_v1  ;;  %v2828_v63 = vld [vmem:[#allocation16] ss:$0 sm:$0xff]  ;;  %v2829_v3 = vld [vmem:[#allocation17] ss:$0 sm:$0xff] }
 0x321   :  { %v1044_v61 = vsel %vm1036_vm11, %v985_v18, %v1043_v17  ;;  %v1735_v17 = vld [vmem:[#allocation19 + $0x48] sm:$0xff]  ;;  %v1737_v18 = vld [vmem:[#allocation19 + $0x58] sm:$0xff] }
 0x322   :  { %3011 = vmatmul.mubr.msk.f32.vlgmr.msra.gmra.mrb[8].mxu1 %vm718_vm3, %v1044_v61  ;;  %3030 = vmatmul.mubr.msk.f32.vlgmr.msra.gmra.mrb[4].mxu0 %vm718_vm3, %v1044_v61 }
 0x323   :  { %3036 = vmatprep.mubr.msk.f32.mxu1 %vm1207_vm12, %v986_v19  ;;  %3188 = vmatpush1.bf16.msra.mxu0 %v3187_v46  ;;  %v1734_v19 = vld [vmem:[#allocation19 + $0x40] sm:$0xff] }
 0x324   :  { %3190 = vmatprep.subr.bf16.mxu0 %v3189_v50  ;;  %1713 = vmatprep.mubr.f32.mxu0 %v3729_v6  ;;  %v4218_v21 = vpack.c.bf16 %v1736_v20, %v1734_v19 }
 0x327   :  { %3192 = vmatpush1.bf16.msra.mxu0 %v3191_v53 }
 0x328   :  { %3194 = vmatprep.subr.bf16.mxu0 %v3193_v57 }
 0x32b   :  { %3196 = vmatpush1.bf16.msra.mxu0 %v3195_v40 }
 0x32c   :  { %3198 = vmatprep.subr.bf16.mxu0 %v3197_v2 }
 0x32f   :  { %3200 = vmatpush1.bf16.msra.mxu0 %v3199_v9 }
 0x330   :  { %3202 = vmatprep.subr.bf16.mxu0 %v4202_v8 }
 0x3f5   :  { %v3031_v22 = vpop.f32.mrb[4].mxu0 }
 0x3f6   :  { %v1198_v23 = vpop.f32.mrb[5].mxu0 }
 0x3f7   :  { %v3161_v24 = vpack.c.bf16 %v3031_v22, %v1198_v23  ;;  %v1739_v22 = vld [vmem:[#allocation19 + $0x68] sm:$0xff]  ;;  %v1741_v23 = vld [vmem:[#allocation19 + $0x78] sm:$0xff] }
 0x3f9   :  { %3162 = vmatprep.subr.bf16.mxu1 %v3161_v24 }
 0x3fa   :  { %3164 = vmatpush3.bf16.msra.mxu1 %v3161_v24  ;;  %v4220_v24 = vpack.c.bf16 %v1741_v23, %v1739_v22 }
 0x3fb   :  { %3166 = vmatprep.subr.bf16.mxu1 %v3165_v25 }
 0x3fd   :  { %3037 = vmatmul.mubr.msk.f32.vlgmr.msra.gmra.mrb[8].mxu1 %vm1207_vm12, %v987_v28  ;;  %v2817_v28 = vld [vmem:[#allocation14] ss:$0 sm:$0xff] }
 0x3fe   :  { %3168 = vmatpush3.bf16.msra.mxu1 %v3165_v25  ;;  %3055 = vmatprep.mubr.msk.f32.mxu1 %vm718_vm3, %v1037_v59  ;;  %v4208_v59 = vpack.c.bf16 %v1733_v15, %v1731_v14  ;;  %v1738_v25 = vld [vmem:[#allocation19 + $0x60] sm:$0xff] }
 0x3ff   :  { %3170 = vmatprep.subr.bf16.mxu1 %v3169_v29  ;;  %v4224_v27 = vpack.c.bf16 %v1740_v26, %v1738_v25 }
 0x402   :  { %3172 = vmatpush3.bf16.msra.mxu1 %v3169_v29 }
 0x403   :  { %3174 = vmatprep.subr.bf16.mxu1 %v3173_v32 }
 0x406   :  { %3176 = vmatpush3.bf16.msra.mxu1 %v3173_v32 }
 0x407   :  { %3178 = vmatprep.subr.bf16.mxu1 %v3177_v35 }
 0x40a   :  { %3180 = vmatpush3.bf16.msra.mxu1 %v3177_v35 }
 0x40d   :  { %3056 = vmatmul.mubr.msk.f32.vlgmr.msra.gmra.mrb[10].mxu1 %vm718_vm3, %v1044_v61  ;;  %v4214_v61 = vpack.c.bf16 %v1737_v18, %v1735_v17 }
 0x40e   :  { %3062 = vmatprep.mubr.msk.f32.mxu1 %vm1207_vm12, %v988_v36 }
 0x4e0   :  { %v3057_v37 = vpop.f32.mrb[10].mxu1 }
 0x4e1   :  { %v1366_v0 = vpop.f32.mrb[11].mxu1 }
 0x4e2   :  { %v3181_v38 = vpack.c.bf16 %v3057_v37, %v1366_v0 }
 0x4e4   :  { %3182 = vmatprep.subr.bf16.mxu1 %v3181_v38 }
 0x4e5   :  { %3184 = vmatpush3.bf16.msra.mxu1 %v3181_v38 }
 0x4e6   :  { %3218 = vmatprep.subr.bf16.mxu1 %v4202_v8 }
 0x4e8   :  { %3063 = vmatmul.mubr.msk.f32.vlgmr.msra.gmra.mrb[8].mxu1 %vm1207_vm12, %v989_v10 }
 0x4e9   :  { %1969 = vmatprep.mubr.f32.mxu1 %v3729_v6  ;;  %3220 = vmatpush1.bf16.msra.mxu1 %v4205_v13 }
 0x4ea   :  { %3222 = vmatprep.subr.bf16.mxu1 %v4208_v59 }
 0x4ed   :  { %3224 = vmatpush1.bf16.msra.mxu1 %v4212_v5 }
 0x4ee   :  { %3226 = vmatprep.subr.bf16.mxu1 %v4214_v61 }
 0x4f1   :  { %3228 = vmatpush1.bf16.msra.mxu1 %v4218_v21 }
 0x4f2   :  { %3230 = vmatprep.subr.bf16.mxu1 %v4220_v24 }
 0x4f5   :  { %3232 = vmatpush1.bf16.msra.mxu1 %v4224_v27 }
 0x4f6   :  { %3250 = vmatprep.subr.bf16.mxu1 %v4202_v8 }
 0x5bb   :  { %v3064_v29 = vpop.f32.mrb[8].mxu1 }
 0x5bc   :  { %v3301_v30 = vadd.f32 %v3064_v29, %v2817_v28  ;;  %v1447_v31 = vpop.f32.mrb[9].mxu1 }
 0x5bd   :  { %v3302_v32 = vadd.f32 %v2817_v28, %v1447_v31 }
 0x5be   :  { %v1459_v33 = vsel %vm718_vm3, %v3301_v30, 0.0 }
 0x5bf   :  { %v1458_v34 = vsel %vm718_vm3, %v3302_v32, 0.0 }
 0x5c0   :  { %v1460_v35 = vadd.f32 %v1459_v33, %v1458_v34 }
 0x5c2   :  { %v1461_v36 = vrot.slane %v1460_v35, 4 }
 0x5c4   :  { %v1462_v37 = vadd.f32 %v1461_v36, %v1460_v35 }
 0x5c6   :  { %v1463_v0 = vrot.slane %v1462_v37, 2 }
 0x5c8   :  { %v1464_v38 = vadd.f32 %v1463_v0, %v1462_v37 }
 0x5ca   :  { %v1465_v10 = vrot.slane %v1464_v38, 1 }
 0x5cc   :  { %v1466_v41 = vadd.f32 %v1465_v10, %v1464_v38 }
 0x5ce   :  { %v1467_v42 = vmul.f32 0.0625, %v1466_v41 }
 0x5d0   :  { %v1468_v43 = vsub.f32 %v3302_v32, %v1467_v42  ;;  %v1469_v44 = vsub.f32 %v3301_v30, %v1467_v42 }
 0x5d2   :  { %v1470_v45 = vmul.f32 %v1468_v43, %v1468_v43  ;;  %v1471_v46 = vmul.f32 %v1469_v44, %v1469_v44 }
 0x5d4   :  { %v1472_v47 = vsel %vm718_vm3, %v1470_v45, 0.0  ;;  %v1473_v48 = vsel %vm718_vm3, %v1471_v46, 0.0 }
 0x5d5   :  { %v1474_v50 = vadd.f32 %v1473_v48, %v1472_v47 }
 0x5d7   :  { %v1475_v51 = vrot.slane %v1474_v50, 4 }
 0x5d9   :  { %v1476_v52 = vadd.f32 %v1475_v51, %v1474_v50 }
 0x5db   :  { %v1477_v53 = vrot.slane %v1476_v52, 2 }
 0x5dd   :  { %v1478_v54 = vadd.f32 %v1477_v53, %v1476_v52 }
 0x5df   :  { %v1479_v55 = vrot.slane %v1478_v54, 1 }
 0x5e1   :  { %v1480_v56 = vadd.f32 %v1479_v55, %v1478_v54 }
 0x5e3   :  { %v1481_v57 = vmul.f32 0.0625, %v1480_v56 }
 0x5e5   :  { %v1482_v58 = vadd.f32 1e-05, %v1481_v57 }
 0x5e7   :  { %3336 = vrsqrt.f32 %v1482_v58 }
 0x5f1   :  { %v3337_v62 = vpop.eup %3336 }
 0x5f2   :  { %v1484_v40 = vmul.f32 %v3337_v62, %v1468_v43  ;;  %v1485_v2 = vmul.f32 %v3337_v62, %v1469_v44 }
 0x5f4   :  { %v1492_v4 = vmul.f32 %v2828_v63, %v1484_v40  ;;  %v1493_v60 = vmul.f32 %v2828_v63, %v1485_v2 }
 0x5f6   :  { %v1500_v7 = vadd.f32 %v2829_v3, %v1492_v4  ;;  %v1501_v9 = vadd.f32 %v2829_v3, %v1493_v60 }
 0x5f8   :  { %v1502_v11 = vmax.f32 %v1500_v7, 0.0  ;;  %v1503_v12 = vmax.f32 %v1501_v9, 0.0 }
 0x5fa   :  { %v1506_v14 = vcombine.high %v1502_v11, %v1502_v11  ;;  %v1513_v15 = vrot.slane %v1502_v11, %v4072_v49  ;;  %v1523_v1 = vcombine.high %v1503_v12, %v1503_v12  ;;  %v1530_v16 = vrot.slane %v1503_v12, %v4072_v49 }
 0x5fc   :  { %v1520_v17 = vrot.slane %v1506_v14, %v4072_v49  ;;  %v1521_v18 = vcombine.high %v1513_v15, %v1513_v15  ;;  %v1537_v19 = vrot.slane %v1523_v1, %v4072_v49  ;;  %v1538_v20 = vcombine.high %v1530_v16, %v1530_v16 }
 0x5fd   :  { %v1548_v22 = vsel %vm873_vm4, %v1513_v15, -inf  ;;  %v1576_v23 = vsel %vm873_vm4, %v1530_v16, -inf }
 0x5fe   :  { %v1522_v25 = vcombine.high %v1520_v17, %v1520_v17  ;;  %v1539_v26 = vcombine.high %v1537_v19, %v1537_v19  ;;  %v1549_v28 = vrot.slane %v1548_v22, 4  ;;  %v1555_v29 = vsel %vm873_vm4, %v1521_v18, -inf }
 0x5ff   :  { %v1556_v30 = vrot.slane %v1555_v29, 4  ;;  %v1562_v31 = vsel %vm873_vm4, %v1520_v17, -inf  ;;  %v1577_v32 = vrot.slane %v1576_v23, 4  ;;  %v1583_v33 = vsel %vm873_vm4, %v1538_v20, -inf }
 0x600   :  { %v1550_v34 = vmax.f32 %v1548_v22, %v1549_v28  ;;  %v1563_v35 = vrot.slane %v1562_v31, 4  ;;  %v1569_v49 = vsel %vm873_vm4, %v1522_v25, -inf  ;;  %v1584_v36 = vrot.slane %v1583_v33, 4 }
 0x601   :  { %v1557_v37 = vmax.f32 %v1555_v29, %v1556_v30  ;;  %v1570_v0 = vrot.slane %v1569_v49, 4  ;;  %v1578_v38 = vmax.f32 %v1576_v23, %v1577_v32  ;;  %v1590_v10 = vsel %vm873_vm4, %v1537_v19, -inf }
 0x602   :  { %v1551_v41 = vrot.slane %v1550_v34, 2  ;;  %v1564_v42 = vmax.f32 %v1562_v31, %v1563_v35  ;;  %v1585_v43 = vmax.f32 %v1583_v33, %v1584_v36  ;;  %v1591_v44 = vrot.slane %v1590_v10, 4  ;;  %v1620_v35 = vld [vmem:[#allocation20] sm:$0x3] }
 0x603   :  { %v1558_v45 = vrot.slane %v1557_v37, 2  ;;  %v1571_v46 = vmax.f32 %v1569_v49, %v1570_v0  ;;  %v1579_v47 = vrot.slane %v1578_v38, 2  ;;  %v1597_v48 = vsel %vm873_vm4, %v1539_v26, -inf }
 0x604   :  { %v1552_v50 = vmax.f32 %v1550_v34, %v1551_v41  ;;  %v1565_v51 = vrot.slane %v1564_v42, 2  ;;  %v1586_v52 = vrot.slane %v1585_v43, 2  ;;  %v1592_v53 = vmax.f32 %v1590_v10, %v1591_v44 }
 0x605   :  { %v1559_v54 = vmax.f32 %v1557_v37, %v1558_v45  ;;  %v1572_v55 = vrot.slane %v1571_v46, 2  ;;  %v1580_v56 = vmax.f32 %v1578_v38, %v1579_v47  ;;  %v1598_v57 = vrot.slane %v1597_v48, 4 }
 0x606   :  { %v1553_v58 = vrot.slane %v1552_v50, 1  ;;  %v1566_v62 = vmax.f32 %v1564_v42, %v1565_v51  ;;  %v1587_v63 = vmax.f32 %v1585_v43, %v1586_v52  ;;  %v1593_v40 = vrot.slane %v1592_v53, 2 }
 0x607   :  { %v1560_v2 = vrot.slane %v1559_v54, 1  ;;  %v1573_v3 = vmax.f32 %v1571_v46, %v1572_v55  ;;  %v1599_v4 = vmax.f32 %v1597_v48, %v1598_v57  ;;  %v1581_v9 = vrot.slane %v1580_v56, 1 }
 0x608   :  { %v1554_v60 = vmax.f32 %v1552_v50, %v1553_v58  ;;  %v1567_v7 = vrot.slane %v1566_v62, 1  ;;  %v1594_v11 = vmax.f32 %v1592_v53, %v1593_v40  ;;  %v1588_v15 = vrot.slane %v1587_v63, 1 }
 0x609   :  { %v1561_v12 = vmax.f32 %v1559_v54, %v1560_v2  ;;  %v1574_v14 = vrot.slane %v1573_v3, 1  ;;  %v1600_v1 = vrot.slane %v1599_v4, 2  ;;  %v1582_v22 = vmax.f32 %v1580_v56, %v1581_v9 }
 0x60a   :  { %v1568_v16 = vmax.f32 %v1566_v62, %v1567_v7  ;;  %v1595_v17 = vrot.slane %v1594_v11, 1  ;;  %v1589_v25 = vmax.f32 %v1587_v63, %v1588_v15  ;;  %v4274_v49 = vsub.s32 1, %v4069_v39 }
 0x60b   :  { %v1575_v18 = vmax.f32 %v1573_v3, %v1574_v14  ;;  %v1601_v19 = vmax.f32 %v1599_v4, %v1600_v1  ;;  %v1640_v20 = vsel %vm1024_vm5, %v1561_v12, %v1554_v60 }
 0x60c   :  { %v1641_v23 = vsel %vm1026_vm6, %v1568_v16, %v1640_v20  ;;  %v1596_v29 = vmax.f32 %v1594_v11, %v1595_v17  ;;  %v1629_v37 = vrot.slane %v1620_v35, %v4274_v49 }
 0x60d   :  { %v1602_v26 = vrot.slane %v1601_v19, 1  ;;  %v1642_v28 = vsel %vm1028_vm7, %v1575_v18, %v1641_v23 }
 0x60e   :  { %v1643_v30 = vsel %vm1030_vm8, %v1582_v22, %v1642_v28 }
 0x60f   :  { %v1603_v31 = vmax.f32 %v1601_v19, %v1602_v26  ;;  %v1644_v32 = vsel %vm1032_vm9, %v1589_v25, %v1643_v30 }
 0x610   :  { %v1645_v33 = vsel %vm1034_vm10, %v1596_v29, %v1644_v32 }
 0x611   :  { %v1646_v34 = vsel %vm1036_vm11, %v1603_v31, %v1645_v33 }
 0x612   :  { %2830 = vmatmul.mubr.msk.f32.vlgmr.msra.gmra.mrb[6].mxu0 %vm718_vm3, %v1646_v34 }
 0x613   :  { %3204 = vmatpush1.bf16.msra.mxu0 %v4205_v13  ;;  %1809 = vmatprep.mubr.f32.mxu0 %v3729_v6 }
 0x614   :  { %3206 = vmatprep.subr.bf16.mxu0 %v4208_v59 }
 0x617   :  { %3208 = vmatpush1.bf16.msra.mxu0 %v4212_v5 }
 0x618   :  { %3210 = vmatprep.subr.bf16.mxu0 %v4214_v61 }
 0x61b   :  { %3212 = vmatpush1.bf16.msra.mxu0 %v4218_v21 }
 0x61c   :  { %3214 = vmatprep.subr.bf16.mxu0 %v4220_v24 }
 0x61f   :  { %3216 = vmatpush1.bf16.msra.mxu0 %v4224_v27 }
 0x620   :  { %3234 = vmatprep.subr.bf16.mxu0 %v4202_v8  ;;  %v4271_v8 = vsub.s32 0, %v4069_v39 }
 0x622   :  { %1810 = vmatmul.mubr.f32.vlgmr.msra.gmra.mrb[8].mxu0 %v3729_v6  ;;  %v1625_v36 = vrot.slane %v1620_v35, %v4271_v8 }
 0x623   :  { %3236 = vmatpush1.bf16.msra.mxu0 %v4205_v13  ;;  %2138 = vmatprep.mubr.f32.mxu0 %v3729_v6 }
 0x624   :  { %3238 = vmatprep.subr.bf16.mxu0 %v4208_v59 }
 0x627   :  { %3240 = vmatpush1.bf16.msra.mxu0 %v4212_v5 }
 0x628   :  { %3242 = vmatprep.subr.bf16.mxu0 %v4214_v61 }
 0x62b   :  { %3244 = vmatpush1.bf16.msra.mxu0 %v4218_v21 }
 0x62c   :  { %3246 = vmatprep.subr.bf16.mxu0 %v4220_v24 }
 0x62f   :  { %3248 = vmatpush1.bf16.msra.mxu0 %v4224_v27 }
 0x6e5   :  { %v1715_v0 = vpop.f32.mrb[6].mxu0 }
 0x6e6   :  { %v1716_v38 = vadd.f32 %v1715_v0, %v1625_v36  ;;  %v1717_v10 = vpop.f32.mrb[7].mxu0 }
 0x6e7   :  { %v1718_v41 = vadd.f32 %v1717_v10, %v1629_v37 }
 0x6e9   :  { %v4278_v42 = vcombine.low %v1716_v38, %v1718_v41  ;;  %v4280_v43 = vcombine.high %v1716_v38, %v1718_v41 }
 0x6f5   :  { %v1811_v44 = vpop.f32.mrb[8].mxu0 }
 0x6f6   :  { %v1813_v45 = vpop.f32.mrb[9].mxu0 }
 0x6f7   :  { %v1818_v46 = vcombine.low %v1811_v44, %v1813_v45 }
 0x6f9   :  { %v1819_v47 = vrot.slane %v1818_v46, 1  ;;  %v1822_v48 = vadd.f32 %v1818_v46, %v4278_v42 }
 0x6fb   :  { %v1824_v50 = vsub.f32 0.0, %v1822_v48  ;;  %1844 = vrot.lane.b32.xlu1 %v1822_v48, %s3730_s13  ;;  %v1823_v51 = vadd.f32 %v1819_v47, %v4280_v43  ;;  %v1838_v55 = vrot.slane %v1822_v48, 4 }
 0x6fd   :  { %v1826_v52 = vmul.f32 1.442695, %v1824_v50  ;;  %v1825_v53 = vsub.f32 0.0, %v1823_v51  ;;  %v1839_v63 = vrot.slane %v1823_v51, 4 }
 0x6ff   :  { %3338 = vpow2.f32 %v1826_v52  ;;  %v1828_v54 = vmul.f32 1.442695, %v1825_v53  ;;  %1846 = vrot.lane.b32.xlu1 %v1823_v51, %s3730_s13 }
 0x701   :  { %3340 = vpow2.f32 %v1828_v54 }
 0x702   :  { %3342 = vtanh.f32 %v1838_v55 }
 0x709   :  { %v3339_v56 = vpop.eup %3338 }
 0x70a   :  { %v1830_v57 = vadd.f32 1.0, %v3339_v56 }
 0x70b   :  { %v3341_v58 = vpop.eup %3340 }
 0x70c   :  { %3344 = vrcp.f32 %v1830_v57  ;;  %v1831_v62 = vadd.f32 1.0, %v3341_v58  ;;  %v3343_v40 = vpop.eup %3342 }
 0x70e   :  { %3346 = vrcp.f32 %v1831_v62 }
 0x70f   :  { %3348 = vtanh.f32 %v1839_v63 }
 0x716   :  { %v3345_v2 = vpop.eup %3344 }
 0x717   :  { %v1866_v3 = vmul.f32 %v3345_v2, %v3343_v40  ;;  %v1864_v9 = vmul.f32 0.0, %v3345_v2 }
 0x718   :  { %v3347_v4 = vpop.eup %3346 }
 0x719   :  { %1870 = vrot.lane.b32.xlu0 %v1866_v3, %s3730_s13  ;;  %v3349_v60 = vpop.eup %3348  ;;  %v1865_v14 = vmul.f32 0.0, %v3347_v4 }
 0x71a   :  { %v1867_v7 = vmul.f32 %v3349_v60, %v3347_v4 }
 0x71d   :  { %1872 = vrot.lane.b32.xlu0 %v1867_v7, %s3730_s13 }
 0x76d   :  { %v1845_v18 = vpop.permute.xlu1 %1844 }
 0x76e   :  { %v1848_v20 = vrot.slane %v1845_v18, 4 }
 0x770   :  { %v1852_v23 = vsub.f32 0.0, %v1848_v20 }
 0x771   :  { %v1847_v19 = vpop.permute.xlu1 %1846 }
 0x772   :  { %v1849_v22 = vrot.slane %v1847_v19, 4  ;;  %v1854_v26 = vmul.f32 1.442695, %v1852_v23 }
 0x774   :  { %v1853_v25 = vsub.f32 0.0, %v1849_v22 }
 0x776   :  { %v1856_v28 = vmul.f32 1.442695, %v1853_v25 }
 0x78b   :  { %v1871_v11 = vpop.permute.xlu0 %1870 }
 0x78c   :  { %v4288_v12 = vadd.f32 %v1871_v11, %v1864_v9 }
 0x78e   :  { %3350 = vtanh.f32 %v4288_v12  ;;  %v2026_v56 = vrot.slane %v4288_v12, 7 }
 0x78f   :  { %v1873_v15 = vpop.permute.xlu0 %1872 }
 0x790   :  { %v4291_v1 = vadd.f32 %v1873_v15, %v1865_v14 }
 0x792   :  { %3352 = vtanh.f32 %v4291_v1  ;;  %v2027_v53 = vrot.slane %v4291_v1, 7 }
 0x793   :  { %3354 = vpow2.f32 %v1854_v26 }
 0x794   :  { %3356 = vpow2.f32 %v1856_v28 }
 0x798   :  { %v3351_v16 = vpop.eup %3350 }
 0x799   :  { %1882 = vrot.lane.b32.xlu0 %v3351_v16, %s3730_s13 }
 0x79c   :  { %v3353_v17 = vpop.eup %3352 }
 0x79d   :  { %1884 = vrot.lane.b32.xlu1 %v3353_v17, %s3730_s13  ;;  %v3355_v29 = vpop.eup %3354 }
 0x79e   :  { %v3357_v30 = vpop.eup %3356  ;;  %v1858_v31 = vadd.f32 1.0, %v3355_v29 }
 0x79f   :  { %v1859_v32 = vadd.f32 1.0, %v3357_v30 }
 0x7a0   :  { %3358 = vrcp.f32 %v1858_v31 }
 0x7a1   :  { %3360 = vrcp.f32 %v1859_v32 }
 0x7aa   :  { %v3359_v34 = vpop.eup %3358 }
 0x7ab   :  { %v3361_v36 = vpop.eup %3360 }
 0x80b   :  { %v1883_v33 = vpop.permute.xlu0 %1882 }
 0x80c   :  { %v1888_v35 = vmul.f32 %v3359_v34, %v1883_v33 }
 0x80e   :  { %v1895_v38 = vrot.slane %v1888_v35, %v4271_v8 }
 0x80f   :  { %v1885_v37 = vpop.permute.xlu1 %1884 }
 0x810   :  { %v1889_v0 = vmul.f32 %v3361_v36, %v1885_v37 }
 0x812   :  { %v1899_v10 = vrot.slane %v1889_v0, %v4271_v8 }
 0x814   :  { %v1900_v41 = vsel %vm1024_vm5, %v1899_v10, %v1895_v38 }
 0x815   :  { %1902 = vst.msk [vmem:[#allocation2] sm:$0x3] %vm873_vm4, %v1900_v41  ;;  %2831 = vmatmul.mubr.msk.f32.vlgmr.msra.gmra.mrb[12].mxu1 %vm718_vm3, %v1900_v41 }
 0x816   :  { %3252 = vmatpush1.bf16.msra.mxu1 %v4205_v13  ;;  %2308 = vmatprep.mubr.f32.mxu1 %v3729_v6 }
 0x817   :  { %3254 = vmatprep.subr.bf16.mxu1 %v4208_v59 }
 0x81a   :  { %3256 = vmatpush1.bf16.msra.mxu1 %v4212_v5 }
 0x81b   :  { %3258 = vmatprep.subr.bf16.mxu1 %v4214_v61 }
 0x81e   :  { %3260 = vmatpush1.bf16.msra.mxu1 %v4218_v21 }
 0x81f   :  { %3262 = vmatprep.subr.bf16.mxu1 %v4220_v24 }
 0x822   :  { %3264 = vmatpush1.bf16.msra.mxu1 %v4224_v27 }
 0x8e8   :  { %v1971_v8 = vpop.f32.mrb[12].mxu1 }
 0x8e9   :  { %v1973_v44 = vpop.f32.mrb[13].mxu1 }
 0x8ea   :  { %v1978_v45 = vcombine.low %v1971_v8, %v1973_v44 }
 0x8ec   :  { %v1979_v46 = vrot.slane %v1978_v45, 7  ;;  %v1983_v13 = vadd.f32 %v1978_v45, %v4280_v43 }
 0x8ee   :  { %v1982_v6 = vadd.f32 %v1979_v46, %v4278_v42  ;;  %v1985_v47 = vsub.f32 0.0, %v1983_v13  ;;  %v1999_v61 = vrot.slane %v1983_v13, 4 }
 0x8f0   :  { %v1984_v59 = vsub.f32 0.0, %v1982_v6  ;;  %v1988_v48 = vmul.f32 1.442695, %v1985_v47  ;;  %v1998_v50 = vrot.slane %v1982_v6, 4 }
 0x8f2   :  { %v1986_v5 = vmul.f32 1.442695, %v1984_v59  ;;  %3362 = vpow2.f32 %v1988_v48 }
 0x8f4   :  { %3364 = vpow2.f32 %v1986_v5 }
 0x8f5   :  { %3366 = vtanh.f32 %v1999_v61 }
 0x8fc   :  { %v3363_v21 = vpop.eup %3362 }
 0x8fd   :  { %v1991_v24 = vadd.f32 1.0, %v3363_v21 }
 0x8fe   :  { %v3365_v51 = vpop.eup %3364 }
 0x8ff   :  { %v1990_v27 = vadd.f32 1.0, %v3365_v51  ;;  %3368 = vrcp.f32 %v1991_v24  ;;  %v3367_v52 = vpop.eup %3366 }
 0x900   :  { %3370 = vtanh.f32 %v1998_v50 }
 0x901   :  { %3372 = vrcp.f32 %v1990_v27 }
 0x909   :  { %v3369_v54 = vpop.eup %3368 }
 0x90a   :  { %v3371_v55 = vpop.eup %3370  ;;  %v2033_v57 = vmul.f32 %v3369_v54, %v3367_v52  ;;  %v2031_v58 = vmul.f32 %v3369_v54, %v2027_v53 }
 0x90b   :  { %v3373_v62 = vpop.eup %3372 }
 0x90c   :  { %2038 = vrot.lane.b32.xlu1 %v2033_v57, %s3730_s13  ;;  %v2032_v63 = vmul.f32 %v3373_v62, %v3371_v55  ;;  %v2030_v40 = vmul.f32 %v3373_v62, %v2026_v56 }
 0x90e   :  { %2036 = vrot.lane.b32.xlu0 %v2032_v63, %s3730_s13 }
 0x910   :  { %2006 = vrot.lane.b32.xlu1 %v1983_v13, %s3730_s13 }
 0x912   :  { %2004 = vrot.lane.b32.xlu0 %v1982_v6, %s3730_s13 }
 0x97e   :  { %v2039_v2 = vpop.permute.xlu1 %2038 }
 0x97f   :  { %v4317_v3 = vadd.f32 %v2039_v2, %v2031_v58 }
 0x980   :  { %v2037_v4 = vpop.permute.xlu0 %2036 }
 0x981   :  { %3374 = vtanh.f32 %v4317_v3  ;;  %v4320_v60 = vadd.f32 %v2037_v4, %v2030_v40  ;;  %v2197_v51 = vrot.slane %v4317_v3, 7 }
 0x982   :  { %v2007_v11 = vpop.permute.xlu1 %2006 }
 0x983   :  { %3376 = vtanh.f32 %v4320_v60  ;;  %v2009_v14 = vrot.slane %v2007_v11, 4  ;;  %v2196_v50 = vrot.slane %v4320_v60, 7 }
 0x984   :  { %v2005_v12 = vpop.permute.xlu0 %2004 }
 0x985   :  { %v2008_v15 = vrot.slane %v2005_v12, 4  ;;  %v2013_v1 = vsub.f32 0.0, %v2009_v14 }
 0x987   :  { %v2012_v16 = vsub.f32 0.0, %v2008_v15  ;;  %v2016_v17 = vmul.f32 1.442695, %v2013_v1 }
 0x989   :  { %v2014_v18 = vmul.f32 1.442695, %v2012_v16  ;;  %3378 = vpow2.f32 %v2016_v17  ;;  %v2230_v17 = vsub.s32 2, %v4069_v39 }
 0x98b   :  { %v3375_v7 = vpop.eup %3374  ;;  %3380 = vpow2.f32 %v2014_v18 }
 0x98c   :  { %2050 = vrot.lane.b32.xlu1 %v3375_v7, %s3730_s13 }
 0x98d   :  { %v3377_v9 = vpop.eup %3376 }
 0x98e   :  { %2048 = vrot.lane.b32.xlu0 %v3377_v9, %s3730_s13 }
 0x993   :  { %v3379_v19 = vpop.eup %3378 }
 0x994   :  { %v2019_v22 = vadd.f32 1.0, %v3379_v19 }
 0x995   :  { %v3381_v20 = vpop.eup %3380 }
 0x996   :  { %v2018_v23 = vadd.f32 1.0, %v3381_v20  ;;  %3382 = vrcp.f32 %v2019_v22 }
 0x998   :  { %3384 = vrcp.f32 %v2018_v23 }
 0x9a0   :  { %v3383_v25 = vpop.eup %3382 }
 0x9a2   :  { %v3385_v29 = vpop.eup %3384 }
 0x9fe   :  { %v2051_v26 = vpop.permute.xlu1 %2050 }
 0x9ff   :  { %v2055_v28 = vmul.f32 %v3383_v25, %v2051_v26 }
 0xa00   :  { %v2049_v30 = vpop.permute.xlu0 %2048 }
 0xa01   :  { %v2054_v31 = vmul.f32 %v3385_v29, %v2049_v30  ;;  %v2065_v32 = vrot.slane %v2055_v28, %v4274_v49 }
 0xa03   :  { %v2061_v33 = vrot.slane %v2054_v31, %v4274_v49 }
 0xa05   :  { %v2066_v34 = vsel %vm1026_vm6, %v2065_v32, %v2061_v33  ;;  %v2071_v35 = vsel %vm1024_vm5, %v2065_v32, %v2061_v33 }
 0xa06   :  { %2070 = vst.msk [vmem:[#allocation2 + $0x1] sm:$0x6] %vm2069_vm13, %v2066_v34  ;;  %2832 = vmatmul.mubr.msk.f32.vlgmr.msra.gmra.mrb[10].mxu0 %vm718_vm3, %v2071_v35 }
 0xad9   :  { %v2140_v36 = vpop.f32.mrb[10].mxu0 }
 0xada   :  { %v2142_v37 = vpop.f32.mrb[11].mxu0 }
 0xadb   :  { %v2147_v0 = vcombine.low %v2140_v36, %v2142_v37 }
 0xadd   :  { %v2148_v38 = vrot.slane %v2147_v0, 6  ;;  %v2149_v10 = vrot.slane %v2147_v0, 7 }
 0xadf   :  { %v2152_v41 = vadd.f32 %v2148_v38, %v4278_v42  ;;  %v2153_v8 = vadd.f32 %v2149_v10, %v4280_v43 }
 0xae1   :  { %v2154_v44 = vsub.f32 0.0, %v2152_v41  ;;  %v2155_v45 = vsub.f32 0.0, %v2153_v8  ;;  %v2168_v13 = vrot.slane %v2152_v41, 4  ;;  %v2169_v6 = vrot.slane %v2153_v8, 4 }
 0xae3   :  { %v2156_v46 = vmul.f32 1.442695, %v2154_v44  ;;  %v2158_v49 = vmul.f32 1.442695, %v2155_v45 }
 0xae5   :  { %3386 = vpow2.f32 %v2156_v46 }
 0xae6   :  { %3388 = vpow2.f32 %v2158_v49 }
 0xae7   :  { %3390 = vtanh.f32 %v2168_v13 }
 0xae8   :  { %3392 = vtanh.f32 %v2169_v6 }
 0xaef   :  { %v3387_v47 = vpop.eup %3386 }
 0xaf0   :  { %v3389_v59 = vpop.eup %3388  ;;  %v2160_v48 = vadd.f32 1.0, %v3387_v47 }
 0xaf1   :  { %v2161_v5 = vadd.f32 1.0, %v3389_v59  ;;  %v3391_v61 = vpop.eup %3390 }
 0xaf2   :  { %3394 = vrcp.f32 %v2160_v48  ;;  %v3393_v21 = vpop.eup %3392 }
 0xaf3   :  { %3396 = vrcp.f32 %v2161_v5 }
 0xafc   :  { %v3395_v24 = vpop.eup %3394 }
 0xafd   :  { %v3397_v27 = vpop.eup %3396  ;;  %v2202_v52 = vmul.f32 %v3395_v24, %v3391_v61  ;;  %v2200_v53 = vmul.f32 %v3395_v24, %v2196_v50 }
 0xafe   :  { %v2203_v54 = vmul.f32 %v3397_v27, %v3393_v21  ;;  %v2201_v55 = vmul.f32 %v3397_v27, %v2197_v51 }
 0xaff   :  { %2206 = vrot.lane.b32.xlu0 %v2202_v52, %s3730_s13 }
 0xb00   :  { %2208 = vrot.lane.b32.xlu1 %v2203_v54, %s3730_s13 }
 0xb03   :  { %2174 = vrot.lane.b32.xlu0 %v2152_v41, %s3730_s13 }
 0xb04   :  { %2176 = vrot.lane.b32.xlu1 %v2153_v8, %s3730_s13 }
 0xb71   :  { %v2207_v56 = vpop.permute.xlu0 %2206 }
 0xb72   :  { %v2209_v57 = vpop.permute.xlu1 %2208  ;;  %v4338_v58 = vadd.f32 %v2207_v56, %v2200_v53 }
 0xb73   :  { %v4340_v62 = vadd.f32 %v2209_v57, %v2201_v55  ;;  %v2415_v55 = vld [vmem:[%s4439_s18] sm:$0xff] }
 0xb74   :  { %3398 = vtanh.f32 %v4338_v58  ;;  %3091 = vmatprep.mubr.msk.f32.mxu0 %vm2436_vm15, %v2415_v55 }
 0xb75   :  { %3400 = vtanh.f32 %v4340_v62  ;;  %v2175_v2 = vpop.permute.xlu0 %2174  ;;  %v2367_v59 = vrot.slane %v4340_v62, 7 }
 0xb76   :  { %v2177_v3 = vpop.permute.xlu1 %2176  ;;  %v2178_v4 = vrot.slane %v2175_v2, 4 }
 0xb77   :  { %v2179_v60 = vrot.slane %v2177_v3, 4 }
 0xb78   :  { %v2182_v7 = vsub.f32 0.0, %v2178_v4 }
 0xb79   :  { %v2183_v9 = vsub.f32 0.0, %v2179_v60 }
 0xb7a   :  { %v2184_v11 = vmul.f32 1.442695, %v2182_v7 }
 0xb7b   :  { %v2186_v12 = vmul.f32 1.442695, %v2183_v9 }
 0xb7c   :  { %3402 = vpow2.f32 %v2184_v11  ;;  %v2400_v11 = vsub.s32 3, %v4069_v39 }
 0xb7d   :  { %3404 = vpow2.f32 %v2186_v12 }
 0xb7e   :  { %v3399_v63 = vpop.eup %3398 }
 0xb7f   :  { %v3401_v40 = vpop.eup %3400  ;;  %2218 = vrot.lane.b32.xlu0 %v3399_v63, %s3730_s13 }
 0xb80   :  { %2220 = vrot.lane.b32.xlu1 %v3401_v40, %s3730_s13 }
 0xb86   :  { %v3403_v14 = vpop.eup %3402 }
 0xb87   :  { %v3405_v15 = vpop.eup %3404  ;;  %v2188_v1 = vadd.f32 1.0, %v3403_v14 }
 0xb88   :  { %v2189_v16 = vadd.f32 1.0, %v3405_v15 }
 0xb89   :  { %3406 = vrcp.f32 %v2188_v1 }
 0xb8a   :  { %3408 = vrcp.f32 %v2189_v16 }
 0xb93   :  { %v3407_v18 = vpop.eup %3406 }
 0xb94   :  { %v3409_v20 = vpop.eup %3408 }
 0xbf1   :  { %v2219_v19 = vpop.permute.xlu0 %2218 }
 0xbf2   :  { %v2221_v22 = vpop.permute.xlu1 %2220  ;;  %v2224_v23 = vmul.f32 %v3407_v18, %v2219_v19 }
 0xbf3   :  { %v2225_v25 = vmul.f32 %v3409_v20, %v2221_v22  ;;  %v2412_v22 = vld [vmem:[#allocation2 + $0x2] sm:$0x3] }
 0xbf4   :  { %v2231_v26 = vrot.slane %v2224_v23, %v2230_v17  ;;  %v2411_v23 = vld [vmem:[#allocation2] sm:$0x3] }
 0xbf5   :  { %v2235_v28 = vrot.slane %v2225_v25, %v2230_v17 }
 0xbf7   :  { %v2236_v29 = vsel %vm1028_vm7, %v2235_v28, %v2231_v26  ;;  %v2241_v30 = vsel %vm1024_vm5, %v2235_v28, %v2231_v26  ;;  %v2430_v26 = vrot.slane %v2412_v22, 7 }
 0xbf8   :  { %2240 = vst.msk [vmem:[#allocation2 + $0x2] sm:$0xc] %vm2239_vm14, %v2236_v29  ;;  %2833 = vmatmul.mubr.msk.f32.vlgmr.msra.gmra.mrb[14].mxu1 %vm718_vm3, %v2241_v30  ;;  %v2611_v29 = vrot.slane %v2411_v23, 1 }
 0xbf9   :  { %3067 = vmatprep.mubr.msk.f32.mxu1 %vm2436_vm15, %v2415_v55 }
 0xbff   :  { %v2413_v25 = vld [vmem:[#allocation2 + $0x4] sm:$0x3] }
 0xc00   :  { %v2432_v28 = vrot.slane %v2413_v25, 6  ;;  %v2613_v30 = vrot.slane %v2413_v25, 7 }
 0xccb   :  { %v2310_v31 = vpop.f32.mrb[14].mxu1 }
 0xccc   :  { %v2312_v32 = vpop.f32.mrb[15].mxu1 }
 0xccd   :  { %v2317_v33 = vcombine.low %v2310_v31, %v2312_v32  ;;  %v2612_v31 = vsel %vm1024_vm5, %v2412_v22, %v2611_v29  ;;  %v2417_v32 = vld [vmem:[%s4437_s16] sm:$0xff] }
 0xccf   :  { %v2318_v34 = vrot.slane %v2317_v33, 5  ;;  %v2319_v35 = vrot.slane %v2317_v33, 6  ;;  %v2418_v33 = vld [vmem:[%s4437_s16 + $0x8] sm:$0xff] }
 0xcd1   :  { %v2322_v36 = vadd.f32 %v2318_v34, %v4278_v42  ;;  %v2323_v37 = vadd.f32 %v2319_v35, %v4280_v43  ;;  %v2366_v43 = vrot.slane %v4338_v58, 7  ;;  %v2431_v34 = vsel %vm1024_vm5, %v2430_v26, %v2411_v23 }
 0xcd3   :  { %v2324_v0 = vsub.f32 0.0, %v2322_v36  ;;  %v2325_v38 = vsub.f32 0.0, %v2323_v37  ;;  %v2338_v8 = vrot.slane %v2322_v36, 4  ;;  %v2339_v44 = vrot.slane %v2323_v37, 4 }
 0xcd5   :  { %v2326_v10 = vmul.f32 1.442695, %v2324_v0  ;;  %v2328_v41 = vmul.f32 1.442695, %v2325_v38  ;;  %v2614_v0 = vsel %vm1026_vm6, %v2613_v30, %v2612_v31  ;;  %v2419_v38 = vld [vmem:[%s4437_s16 + $0x10] sm:$0xff] }
 0xcd7   :  { %3410 = vpow2.f32 %v2326_v10  ;;  %v2420_v10 = vld [vmem:[%s4437_s16 + $0x18] sm:$0xff] }
 0xcd8   :  { %3412 = vpow2.f32 %v2328_v41 }
 0xcd9   :  { %3414 = vtanh.f32 %v2338_v8 }
 0xcda   :  { %3416 = vtanh.f32 %v2339_v44  ;;  %v2416_v44 = vld [vmem:[%s4439_s18 + $0x8] sm:$0xff] }
 0xce1   :  { %v3411_v45 = vpop.eup %3410 }
 0xce2   :  { %v3413_v46 = vpop.eup %3412  ;;  %v2330_v49 = vadd.f32 1.0, %v3411_v45  ;;  %v3265_v45 = vpack.c.bf16 %v2418_v33, %v2417_v32 }
 0xce3   :  { %v2331_v13 = vadd.f32 1.0, %v3413_v46  ;;  %v3415_v6 = vpop.eup %3414  ;;  %v3269_v46 = vpack.c.bf16 %v2420_v10, %v2419_v38 }
 0xce4   :  { %3418 = vrcp.f32 %v2330_v49  ;;  %v3417_v42 = vpop.eup %3416  ;;  %v2421_v49 = vld [vmem:[%s4437_s16 + $0x20] sm:$0xff] }
 0xce5   :  { %3420 = vrcp.f32 %v2331_v13  ;;  %v2422_v13 = vld [vmem:[%s4437_s16 + $0x28] sm:$0xff] }
 0xcee   :  { %v3419_v47 = vpop.eup %3418 }
 0xcef   :  { %v3421_v48 = vpop.eup %3420  ;;  %v2372_v5 = vmul.f32 %v3419_v47, %v3415_v6  ;;  %v2370_v61 = vmul.f32 %v3419_v47, %v2366_v43  ;;  %v3273_v6 = vpack.c.bf16 %v2422_v13, %v2421_v49  ;;  %v2424_v43 = vld [vmem:[%s4437_s16 + $0x38] sm:$0xff] }
 0xcf0   :  { %v2373_v21 = vmul.f32 %v3421_v48, %v3417_v42  ;;  %v2371_v50 = vmul.f32 %v3421_v48, %v2367_v59  ;;  %v2423_v42 = vld [vmem:[%s4437_s16 + $0x30] sm:$0xff] }
 0xcf1   :  { %2376 = vrot.lane.b32.xlu0 %v2372_v5, %s3730_s13  ;;  %v3277_v47 = vpack.c.bf16 %v2424_v43, %v2423_v42 }
 0xcf2   :  { %2378 = vrot.lane.b32.xlu1 %v2373_v21, %s3730_s13  ;;  %v2837_v21 = vld [vmem:[%s4438_s17] ss:$0 sm:$0xff] }
 0xcf5   :  { %2344 = vrot.lane.b32.xlu0 %v2322_v36, %s3730_s13 }
 0xcf6   :  { %2346 = vrot.lane.b32.xlu1 %v2323_v37, %s3730_s13  ;;  %v2433_v37 = vsel %vm1026_vm6, %v2432_v28, %v2431_v34 }
 0xd63   :  { %v2377_v24 = vpop.permute.xlu0 %2376 }
 0xd64   :  { %v2379_v51 = vpop.permute.xlu1 %2378  ;;  %v2382_v27 = vadd.f32 %v2377_v24, %v2370_v61 }
 0xd65   :  { %v2383_v52 = vadd.f32 %v2379_v51, %v2371_v50 }
 0xd66   :  { %3422 = vtanh.f32 %v2382_v27 }
 0xd67   :  { %3424 = vtanh.f32 %v2383_v52  ;;  %v2345_v56 = vpop.permute.xlu0 %2344 }
 0xd68   :  { %v2347_v57 = vpop.permute.xlu1 %2346  ;;  %v2348_v58 = vrot.slane %v2345_v56, 4 }
 0xd69   :  { %v2349_v62 = vrot.slane %v2347_v57, 4 }
 0xd6a   :  { %v2352_v63 = vsub.f32 0.0, %v2348_v58 }
 0xd6b   :  { %v2353_v40 = vsub.f32 0.0, %v2349_v62 }
 0xd6c   :  { %v2354_v2 = vmul.f32 1.442695, %v2352_v63 }
 0xd6d   :  { %v2356_v3 = vmul.f32 1.442695, %v2353_v40 }
 0xd6e   :  { %3426 = vpow2.f32 %v2354_v2 }
 0xd6f   :  { %3428 = vpow2.f32 %v2356_v3 }
 0xd70   :  { %v3423_v53 = vpop.eup %3422 }
 0xd71   :  { %v3425_v54 = vpop.eup %3424  ;;  %2388 = vrot.lane.b32.xlu0 %v3423_v53, %s3730_s13 }
 0xd72   :  { %2390 = vrot.lane.b32.xlu1 %v3425_v54, %s3730_s13 }
 0xd78   :  { %v3427_v4 = vpop.eup %3426 }
 0xd79   :  { %v3429_v60 = vpop.eup %3428  ;;  %v2358_v7 = vadd.f32 1.0, %v3427_v4 }
 0xd7a   :  { %v2359_v9 = vadd.f32 1.0, %v3429_v60 }
 0xd7b   :  { %3430 = vrcp.f32 %v2358_v7 }
 0xd7c   :  { %3432 = vrcp.f32 %v2359_v9 }
 0xd85   :  { %v3431_v12 = vpop.eup %3430 }
 0xd86   :  { %v3433_v15 = vpop.eup %3432 }
 0xde3   :  { %v2389_v14 = vpop.permute.xlu0 %2388 }
 0xde4   :  { %v2391_v1 = vpop.permute.xlu1 %2390  ;;  %v2394_v16 = vmul.f32 %v3431_v12, %v2389_v14 }
 0xde5   :  { %v2395_v17 = vmul.f32 %v3433_v15, %v2391_v1 }
 0xde6   :  { %v2401_v18 = vrot.slane %v2394_v16, %v2400_v11 }
 0xde7   :  { %v2405_v19 = vrot.slane %v2395_v17, %v2400_v11 }
 0xde9   :  { %v2406_v20 = vsel %vm1030_vm8, %v2405_v19, %v2401_v18 }
 0xdea   :  { %2410 = vst.msk [vmem:[#allocation2 + $0x3] sm:$0x18] %vm2409_vm0, %v2406_v20 }
 0xdf1   :  { %v2414_v39 = vld [vmem:[#allocation2 + $0x6] sm:$0x3] }
 0xdf2   :  { %v2434_v35 = vrot.slane %v2414_v39, 5  ;;  %v2615_v36 = vrot.slane %v2414_v39, 6 }
 0xdf4   :  { %v2435_v41 = vsel %vm1028_vm7, %v2434_v35, %v2433_v37  ;;  %v2616_v8 = vsel %vm1028_vm7, %v2615_v36, %v2614_v0 }
 0xdf5   :  { %3065 = vmatprep.subr.msk.mxu1 %vm2443_vm1, %v2435_v41  ;;  %3089 = vmatprep.subr.msk.mxu0 %vm2443_vm1, %v2616_v8 }
 0xdf6   :  { %3066 = vmatpush3.msk.msra.mxu1 %vm2443_vm1, %v2435_v41  ;;  %3090 = vmatpush3.msk.msra.mxu0 %vm2443_vm1, %v2616_v8 }
 0xdf7   :  { %3068 = vmatmul.mubr.msk.f32.vlgmr.msra.gmra.mrb[16].mxu1 %vm2436_vm15, %v2416_v44  ;;  %3092 = vmatmul.mubr.msk.f32.vlgmr.msra.gmra.mrb[12].mxu0 %vm2436_vm15, %v2416_v44 }
 0xdf8   :  { %3266 = vmatprep.subr.bf16.mxu1 %v3265_v45  ;;  %3282 = vmatprep.subr.bf16.mxu0 %v3265_v45 }
 0xdf9   :  { %3268 = vmatpush3.bf16.msra.mxu1 %v3265_v45  ;;  %3284 = vmatpush3.bf16.msra.mxu0 %v3265_v45 }
 0xdfa   :  { %3270 = vmatprep.subr.bf16.mxu1 %v3269_v46  ;;  %3286 = vmatprep.subr.bf16.mxu0 %v3269_v46 }
 0xdfd   :  { %3272 = vmatpush3.bf16.msra.mxu1 %v3269_v46  ;;  %3288 = vmatpush3.bf16.msra.mxu0 %v3269_v46 }
 0xdfe   :  { %3274 = vmatprep.subr.bf16.mxu1 %v3273_v6  ;;  %3290 = vmatprep.subr.bf16.mxu0 %v3273_v6 }
 0xe01   :  { %3276 = vmatpush3.bf16.msra.mxu1 %v3273_v6  ;;  %3292 = vmatpush3.bf16.msra.mxu0 %v3273_v6 }
 0xe02   :  { %3278 = vmatprep.subr.bf16.mxu1 %v3277_v47  ;;  %3294 = vmatprep.subr.bf16.mxu0 %v3277_v47 }
 0xe05   :  { %3280 = vmatpush3.bf16.msra.mxu1 %v3277_v47  ;;  %3296 = vmatpush3.bf16.msra.mxu0 %v3277_v47 }
 0xeca   :  { %v3069_v59 = vpop.f32.mrb[16].mxu1  ;;  %v3093_v48 = vpop.f32.mrb[12].mxu0 }
 0xecb   :  { %v2512_v5 = vpop.f32.mrb[17].mxu1  ;;  %v2685_v61 = vpop.f32.mrb[13].mxu0 }
 0xecc   :  { %3086 = vmatprep.mubr.msk.f32.mxu1 %vm718_vm3, %v2512_v5  ;;  %3110 = vmatprep.mubr.msk.f32.mxu0 %vm718_vm3, %v2685_v61 }
 0xecd   :  { %3087 = vmatmul.mubr.msk.f32.vlgmr.msra.gmra.mrb[18].mxu1 %vm718_vm3, %v3069_v59  ;;  %3111 = vmatmul.mubr.msk.f32.vlgmr.msra.gmra.mrb[14].mxu0 %vm718_vm3, %v3093_v48 }
 0xfa0   :  { %v3088_v50 = vpop.f32.mrb[18].mxu1  ;;  %v3112_v24 = vpop.f32.mrb[14].mxu0 }
 0xfa1   :  { %v2605_v51 = vadd.f32 %v3088_v50, %v2837_v21  ;;  %v2772_v27 = vadd.f32 %v3112_v24, %v2837_v21  ;;  %v2599_v52 = vpop.f32.mrb[19].mxu1  ;;  %v2766_v53 = vpop.f32.mrb[15].mxu0 }
 0xfa2   :  { %v2600_v54 = vadd.f32 %v2837_v21, %v2599_v52  ;;  %v2767_v55 = vadd.f32 %v2837_v21, %v2766_v53 }
 0xfa3   :  { %2610 = vst.msk [vmem:[%s4440_s19 + $0x8] sm:$0xff] %vm2608_vm2, %v2605_v51  ;;  %2846 = vst.msk [vmem:[%s4440_s19 + $0x18] sm:$0xff] %vm2608_vm2, %v2772_v27 }
 0xfa4   :  { %2609 = vst.msk [vmem:[%s4440_s19] sm:$0xff] %vm2608_vm2, %v2600_v54  ;;  %2845 = vst.msk [vmem:[%s4440_s19 + $0x10] sm:$0xff] %vm2608_vm2, %v2767_v55 }
 0xfa5   :  { %2782 = vsyncpa [#allocation4], 1 }
 0xfa6   :  { %2783 = vsyncpa [#allocation6], 1 }
 0xfa7   :  { %2784 = vsyncpa [#allocation9], 1 }
 0xfa8   :  { %2785 = vsyncpa [#allocation12], 1 }
 0xfa9   :  { %2786 = vsyncpa [#allocation15], 1 }
 0xfaa   :  { %2787 = vsyncpa [#allocation18], 1 }
 0xfab   :  { %2788 = vsyncpa [#allocation21], 1 }

</bundles_post_ra>
